<compile_context>
chip_gen: v6e
topology: v6e:2x2x1
jax: 0.10.0
libtpu: 0.0.40
codegen_flags: <defaults>
</compile_context>

<pallas_src>
import math

import jax
import jax.numpy as jnp
from jax.experimental import pallas as pl
from jax.experimental.pallas import tpu as pltpu


def _round_up(x, m):
    return (x + m - 1) // m * m


def pack_params(weights, biases):
    """Pack all (din,dout) weights and (dout,) biases into one (R,128) f32 slab.

    Every tensor sits at a statically known, 8-row-aligned offset, so the
    kernel gets a single resident VMEM input and slices it with static ref
    slices.  Returns (slab, layout) with layout[l] = (w_row, b_row, din, dout).
    """
    blocks, layout, row = [], [], 0
    for w, b in zip(weights, biases):
        din, dout = w.shape
        assert dout <= 128, "pack_params assumes out-features <= 128"
        din_pad = _round_up(din, 8)
        wp = jnp.zeros((din_pad, 128), jnp.float32).at[:din, :dout].set(w)
        bp = jnp.zeros((8, 128), jnp.float32).at[0, :dout].set(b)
        layout.append((row, row + din_pad, din, dout))
        blocks += [wp, bp]
        row += din_pad + 8
    return jnp.concatenate(blocks, axis=0), tuple(layout)


def _pick_batch_tile(B, N, per_graph_bytes, budget_bytes):
    """Largest-useful batch tile: fits the VMEM budget, keeps >=2 grid steps,
    prefers sublane-aligned (tb % 8 == 0) tiles, targets ~512 rows per step."""
    divisors = [d for d in range(1, B + 1) if B % d == 0]
    fits = [d for d in divisors if d * per_graph_bytes <= budget_bytes] or [1]
    multi = [d for d in fits if B // d >= 2] or fits
    aligned = [d for d in multi if d % 8 == 0 or d == B] or multi
    big = [d for d in aligned if d * N >= 512]
    return min(big) if big else max(aligned)


def make_gae_kernel(tb, N, dims, layout, pr_pad, pz_pad, normalize, mxu_dtype):
    F = dims[0]          # input_dim (one-hot op width)
    Z = dims[-1]         # embedding_dim
    n_gc = len(dims) - 1
    M = tb * N
    Cr = F + N           # per-node recon payload (ops sigmoid | adj-row sigmoid)

    def rows_to_lanes(x3):
        # (tb, N, C) -> (tb, N*C) row-major, built from static sublane slices +
        # one lane concat (avoids a minor-dim-merging reshape inside Mosaic).
        return jnp.concatenate([x3[:, n, :] for n in range(N)], axis=-1)

    def kernel(ops_ref, adj_ref, par_ref, recon_ref, z_ref, adj_vmem):
        # ---- adjacency: int8 -> f32 (optional row-normalise) -> mxu dtype,
        #      staged once in a VMEM scratch and re-read per layer.
        a = adj_ref[...].astype(jnp.float32)                   # (tb, N, N)
        if normalize:
            # TODO(synk): arch2vec's normalize_adj (symmetric D^-1/2 (A+I) D^-1/2)
            # is not part of the given spec; simple row normalisation is used.
            deg = jnp.sum(a, axis=-1, keepdims=True)
            a = a * pl.reciprocal(jnp.maximum(deg, 1.0), approx=True)
        adj_vmem[...] = a.astype(mxu_dtype)

        # ---- Encoder: stacked GraphConvolution layers  x <- adj @ (x @ W) + b
        # TODO(synk): GraphConvolution source not in spec; pygcn-style
        # adj@(x@W)+b with eval-mode dropout (= identity) and no intra-layer
        # nonlinearity is assumed.
        x_mx = ops_ref[...].astype(mxu_dtype).reshape(M, F)    # (tb*N, F)
        x_f32 = None
        for l in range(n_gc):
            w_row, b_row, din, dout = layout[l]
            w = par_ref[w_row:w_row + din, 0:dout].astype(mxu_dtype)   # static ref slice
            b = par_ref[b_row:b_row + 1, 0:dout]                        # (1, dout) f32
            support = jnp.dot(x_mx, w, preferred_element_type=jnp.float32)
            support3 = support.reshape(tb, N, dout).astype(mxu_dtype)
            agg = jnp.einsum('bij,bjd->bid', adj_vmem[...], support3,
                             preferred_element_type=jnp.float32)
            x_f32 = agg.reshape(M, dout) + b                   # f32 bias add
            x_mx = x_f32.astype(mxu_dtype)

        # ---- Decoder (eval-mode dropout = identity) -------------------------
        w_row, b_row, din, dout = layout[n_gc]                 # (Z, F) / (F,)
        wd = par_ref[w_row:w_row + din, 0:dout].astype(mxu_dtype)
        bd = par_ref[b_row:b_row + 1, 0:dout]
        ops_logits = jnp.dot(x_mx, wd, preferred_element_type=jnp.float32) + bd
        ops_sig = jax.nn.sigmoid(ops_logits).reshape(tb, N, F)

        z_mx = x_mx.reshape(tb, N, Z)
        adj_logits = jnp.einsum('bnd,bmd->bnm', z_mx, z_mx,
                                preferred_element_type=jnp.float32)
        adj_sig = jax.nn.sigmoid(adj_logits)                   # (tb, N, N) f32

        # ---- lane-dense packed stores (per-graph payload flattened to lanes)
        recon3 = jnp.concatenate([ops_sig, adj_sig], axis=-1)  # (tb, N, F+N)
        recon_flat = rows_to_lanes(recon3).astype(recon_ref.dtype)
        if pr_pad > N * Cr:
            recon_flat = jnp.concatenate(
                [recon_flat, jnp.zeros((tb, pr_pad - N * Cr), recon_ref.dtype)],
                axis=-1)
        recon_ref[...] = recon_flat                            # (tb, pr_pad) bf16

        z3 = x_f32.reshape(tb, N, Z)                           # f32 embeddings
        z_flat = rows_to_lanes(z3)
        if pz_pad > N * Z:
            z_flat = jnp.concatenate(
                [z_flat, jnp.zeros((tb, pz_pad - N * Z), jnp.float32)], axis=-1)
        z_ref[...] = z_flat                                    # (tb, pz_pad) f32

    return kernel


def gae_forward(ops, adj, weights, biases, *, dims, batch_tile=None,
                normalize=False, reg_emb=False, reg_dec_l2=False,
                reg_dec_gp=False, bf16_matmul=True):
    B, N, F = ops.shape
    assert F == dims[0] and len(dims) >= 2
    Z = dims[-1]
    # TODO(synk): pad N/B in the wrapper for shapes that do not divide evenly.
    assert N % 8 == 0, "N must be a multiple of 8"

    slab, layout = pack_params(weights, biases)
    R = slab.shape[0]
    mxu_dtype = jnp.bfloat16 if bf16_matmul else jnp.float32

    Cr = F + N
    pr_pad = _round_up(N * Cr, 128)   # packed (ops|adj) sigmoid payload (bf16)
    pz_pad = _round_up(N * Z, 128)    # packed embedding payload (f32)

    # ---- per-generation VMEM budget and batch-tile selection ---------------
    vmem_cap = 64 * 1024 * 1024                       # conservative (v7x per-TC)
    try:
        vmem_cap = int(pltpu.get_tpu_info().vmem_capacity_bytes)
    except Exception:
        pass
    vmem_limit = min(vmem_cap // 2, 64 * 1024 * 1024)  # 64 MiB v5e/v6e, 32 MiB v7x

    d_max = max(dims)
    per_graph = (2 * (N * F * 2 + N * N * 1 + pr_pad * 2 + pz_pad * 4)  # dbl-buffered I/O
                 + N * N * 2 * (2 if bf16_matmul else 4)                # adj scratch + copy
                 + 4 * N * d_max * 4 + 2 * N * N * 4)                   # live intermediates
    tb = batch_tile if batch_tile is not None else \
        _pick_batch_tile(B, N, per_graph, vmem_limit // 2)
    assert B % tb == 0

    kernel = make_gae_kernel(tb, N, dims, layout, pr_pad, pz_pad,
                             normalize, mxu_dtype)

    n_gc = len(dims) - 1
    flops = sum(2 * B * N * dims[l] * dims[l + 1] + 2 * B * N * N * dims[l + 1]
                for l in range(n_gc))
    flops += 2 * B * N * Z * F + 2 * B * N * N * Z
    bytes_accessed = (B * N * F * 2 + B * N * N * 1 + int(slab.size) * 4
                      + B * pr_pad * 2 + B * pz_pad * 4)
    cost = pl.CostEstimate(flops=flops, transcendentals=B * N * (F + N),
                           bytes_accessed=bytes_accessed)

    recon_p, z_p = pl.pallas_call(
        kernel,
        out_shape=(jax.ShapeDtypeStruct((B, pr_pad), jnp.bfloat16),
                   jax.ShapeDtypeStruct((B, pz_pad), jnp.float32)),
        grid=(B // tb,),
        in_specs=[
            pl.BlockSpec((tb, N, F), lambda i: (i, 0, 0)),     # ops  (bf16, exact one-hot)
            pl.BlockSpec((tb, N, N), lambda i: (i, 0, 0)),     # adj  (int8, binary)
            pl.BlockSpec((R, 128), lambda i: (0, 0)),          # resident param slab
        ],
        out_specs=(
            pl.BlockSpec((tb, pr_pad), lambda i: (i, 0)),      # lane-dense bf16 recon
            pl.BlockSpec((tb, pz_pad), lambda i: (i, 0)),      # lane-dense f32 embeddings
        ),
        scratch_shapes=[pltpu.VMEM((tb, N, N), mxu_dtype)],    # staged adjacency
        compiler_params=pltpu.CompilerParams(
            dimension_semantics=("parallel",),                 # megacore sharding
            vmem_limit_bytes=vmem_limit,
        ),
        cost_estimate=cost,
    )(ops.astype(jnp.bfloat16), adj.astype(jnp.int8), slab)

    recon = recon_p[:, :N * Cr].reshape(B, N, Cr).astype(jnp.float32)
    ops_recon = recon[..., :F]
    adj_recon = recon[..., F:]
    x = z_p[:, :N * Z].reshape(B, N, Z)                        # f32 node embeddings

    # Scalar regularisers (Encoder.reg_emb / GAE return-tuple logic).
    if reg_emb:
        emb = jnp.mean(x, axis=1)                              # (B, Z)
        emb_loss = jnp.mean(jnp.sqrt(jnp.sum(emb * emb, axis=-1)))
    else:
        emb_loss = jnp.asarray(0.0, jnp.float32)

    if reg_dec_l2:
        dec_loss = (jnp.sqrt(jnp.sum(weights[-1] ** 2)) +
                    jnp.sqrt(jnp.sum(biases[-1] ** 2)))
        return ops_recon, adj_recon, emb_loss, dec_loss, None
    if reg_dec_gp:
        return ops_recon, adj_recon, emb_loss, jnp.asarray(0.0, jnp.float32), x
    return ops_recon, adj_recon, emb_loss, jnp.asarray(0.0, jnp.float32), None


def gae_reference(ops, adj, weights, biases, dims, normalize=False):
    """Pure-JAX f32 reference of the same forward (for validation)."""
    a = adj
    if normalize:
        deg = jnp.sum(a, axis=-1, keepdims=True)
        a = a / jnp.maximum(deg, 1.0)
    x = ops
    L = len(dims) - 1
    for l in range(L):
        x = jnp.einsum('bij,bjd->bid', a, x @ weights[l]) + biases[l]
    z = x
    ops_recon = jax.nn.sigmoid(z @ weights[L] + biases[L])
    adj_recon = jax.nn.sigmoid(jnp.einsum('bnd,bmd->bnm', z, z))
    return ops_recon, adj_recon, z


def init_params(key, dims):
    """GraphConvolution weights/biases + decoder Linear(embedding->input)."""
    L = len(dims) - 1
    keys = jax.random.split(key, 2 * (L + 1))
    weights, biases = [], []
    k = 0
    for l in range(L):
        din, dout = dims[l], dims[l + 1]
        stdv = 1.0 / math.sqrt(dout)
        weights.append(jax.random.uniform(keys[k], (din, dout), jnp.float32,
                                          -stdv, stdv)); k += 1
        biases.append(jax.random.uniform(keys[k], (dout,), jnp.float32,
                                         -stdv, stdv)); k += 1
    din, dout = dims[-1], dims[0]
    bound = 1.0 / math.sqrt(din)
    weights.append(jax.random.uniform(keys[k], (din, dout), jnp.float32,
                                      -bound, bound)); k += 1
    biases.append(jax.random.uniform(keys[k], (dout,), jnp.float32,
                                     -bound, bound)); k += 1
    return weights, biases


if __name__ == "__main__":
    B, N = 16, 8
    dims = [8, 32, 32, 16]        # input_dim=8, hidden GCN dims, embedding=16

    key = jax.random.PRNGKey(0)
    k_ops, k_adj, k_par = jax.random.split(key, 3)

    op_ids = jax.random.randint(k_ops, (B, N), 0, dims[0])
    ops = jax.nn.one_hot(op_ids, dims[0], dtype=jnp.float32)
    adj = (jax.random.uniform(k_adj, (B, N, N)) < 0.3).astype(jnp.float32)

    weights, biases = init_params(k_par, dims)

    ops_recon, adj_recon, emb_loss, reg_zero, x = gae_forward(
        ops, adj, weights, biases, dims=dims,
        normalize=False, reg_emb=True, reg_dec_l2=False, reg_dec_gp=True,
        bf16_matmul=True)
    jax.block_until_ready((ops_recon, adj_recon, emb_loss, reg_zero, x))

    assert ops_recon.shape == (B, N, dims[0])
    assert adj_recon.shape == (B, N, N)
    assert x.shape == (B, N, dims[-1])
    assert emb_loss.shape == ()

    # Light validation against a pure-JAX f32 reference (generous tolerances
    # because the kernel runs bf16 MXU contractions with f32 accumulation).
    o_ref, a_ref, x_ref = gae_reference(ops, adj, weights, biases, dims)

    def close(a, b, atol=0.05, rtol=0.05):
        return float(jnp.max(jnp.abs(a - b))) <= atol + rtol * float(jnp.max(jnp.abs(b)))

    assert close(ops_recon, o_ref)
    assert close(adj_recon, a_ref)
    assert close(x, x_ref)

    print("KERNEL_OK")
</pallas_src>

<mosaic_0001>
module attributes {stable_mosaic.version = 11 : i64} {
  func.func @kernel(%arg0: i32, %arg1: memref<8x8x8xbf16, #tpu.memory_space<vmem>>, %arg2: memref<8x8x8xi8, #tpu.memory_space<vmem>>, %arg3: memref<120x128xf32, #tpu.memory_space<vmem>>, %arg4: memref<8x128xbf16, #tpu.memory_space<vmem>>, %arg5: memref<8x128xf32, #tpu.memory_space<vmem>>, %arg6: memref<8x8x8xbf16, #tpu.memory_space<vmem>>) attributes {dimension_semantics = [#tpu.dimension_semantics<parallel>], iteration_bounds = array<i64: 2>, scalar_prefetch = 0 : i64, scratch_operands = 1 : i64, tpu.core_type = #tpu.core_type<tc>, window_params = [{transform_indices = @transform_0, window_bounds = array<i64: 8, 8, 8>}, {transform_indices = @transform_1, window_bounds = array<i64: 8, 8, 8>}, {pipeline_mode = #tpu.pipeline_mode<synchronous>, transform_indices = @transform_2, window_bounds = array<i64: 120, 128>}, {transform_indices = @transform_3, window_bounds = array<i64: 8, 128>}, {transform_indices = @transform_4, window_bounds = array<i64: 8, 128>}]} {
    %c0 = arith.constant 0 : index
    %c0_0 = arith.constant 0 : index
    %c0_1 = arith.constant 0 : index
    %0 = vector.load %arg2[%c0, %c0_0, %c0_1] : memref<8x8x8xi8, #tpu.memory_space<vmem>>, vector<8x8x8xi8>
    %1 = arith.sitofp %0 : vector<8x8x8xi8> to vector<8x8x8xf32>
    %2 = arith.truncf %1 : vector<8x8x8xf32> to vector<8x8x8xbf16>
    %c0_2 = arith.constant 0 : index
    %c0_3 = arith.constant 0 : index
    %c0_4 = arith.constant 0 : index
    %3 = vector.load %arg6[%c0_2, %c0_3, %c0_4] : memref<8x8x8xbf16, #tpu.memory_space<vmem>>, vector<8x8x8xbf16>
    tpu.vector_store %arg6[%c0_2, %c0_3, %c0_4], %2 {strides = array<i32>} : memref<8x8x8xbf16, #tpu.memory_space<vmem>>, vector<8x8x8xbf16>,
    %c0_5 = arith.constant 0 : index
    %c0_6 = arith.constant 0 : index
    %c0_7 = arith.constant 0 : index
    %4 = vector.load %arg1[%c0_5, %c0_6, %c0_7] : memref<8x8x8xbf16, #tpu.memory_space<vmem>>, vector<8x8x8xbf16>
    %5 = vector.shape_cast %4 : vector<8x8x8xbf16> to vector<64x8xbf16>
    %c0_8 = arith.constant 0 : index
    %c0_9 = arith.constant 0 : index
    %6 = vector.load %arg3[%c0_8, %c0_9] : memref<120x128xf32, #tpu.memory_space<vmem>>, vector<8x32xf32>
    %7 = arith.truncf %6 : vector<8x32xf32> to vector<8x32xbf16>
    %c8 = arith.constant 8 : index
    %c0_10 = arith.constant 0 : index
    %8 = vector.load %arg3[%c8, %c0_10] : memref<120x128xf32, #tpu.memory_space<vmem>>, vector<1x32xf32>
    %cst = arith.constant dense<0.000000e+00> : vector<64x32xf32>
    %9 = tpu.matmul %5, %7, %cst {dimension_numbers = #tpu.dot_dimension_numbers<[1], [0], [0], [1], [0, 0, 1, 1], [], []>} : vector<64x8xbf16>, vector<8x32xbf16>, vector<64x32xf32> -> vector<64x32xf32>
    %10 = vector.shape_cast %9 : vector<64x32xf32> to vector<8x8x32xf32>
    %11 = arith.truncf %10 : vector<8x8x32xf32> to vector<8x8x32xbf16>
    %c0_11 = arith.constant 0 : index
    %c0_12 = arith.constant 0 : index
    %c0_13 = arith.constant 0 : index
    %12 = vector.load %arg6[%c0_11, %c0_12, %c0_13] : memref<8x8x8xbf16, #tpu.memory_space<vmem>>, vector<8x8x8xbf16>
    "tpu.trace_start"() <{level = 10 : i32, message = "bij,bjd->bid"}> : () -> ()
    %cst_14 = arith.constant dense<0.000000e+00> : vector<8x8x32xf32>
    %13 = tpu.matmul %12, %11, %cst_14 {dimension_numbers = #tpu.dot_dimension_numbers<[2], [1], [1], [2], [0, 0, 0, 1, 1, 2], [0], [0]>} : vector<8x8x8xbf16>, vector<8x8x32xbf16>, vector<8x8x32xf32> -> vector<8x8x32xf32>
    "tpu.trace_stop"() : () -> ()
    %14 = vector.shape_cast %13 : vector<8x8x32xf32> to vector<64x32xf32>
    %15 = vector.broadcast %8 : vector<1x32xf32> to vector<64x32xf32>
    %16 = arith.addf %14, %15 : vector<64x32xf32>
    %17 = arith.truncf %16 : vector<64x32xf32> to vector<64x32xbf16>
    %c16 = arith.constant 16 : index
    %c0_15 = arith.constant 0 : index
    %18 = vector.load %arg3[%c16, %c0_15] : memref<120x128xf32, #tpu.memory_space<vmem>>, vector<32x32xf32>
    %19 = arith.truncf %18 : vector<32x32xf32> to vector<32x32xbf16>
    %c48 = arith.constant 48 : index
    %c0_16 = arith.constant 0 : index
    %20 = vector.load %arg3[%c48, %c0_16] : memref<120x128xf32, #tpu.memory_space<vmem>>, vector<1x32xf32>
    %cst_17 = arith.constant dense<0.000000e+00> : vector<64x32xf32>
    %21 = tpu.matmul %17, %19, %cst_17 {dimension_numbers = #tpu.dot_dimension_numbers<[1], [0], [0], [1], [0, 0, 1, 1], [], []>} : vector<64x32xbf16>, vector<32x32xbf16>, vector<64x32xf32> -> vector<64x32xf32>
    %22 = vector.shape_cast %21 : vector<64x32xf32> to vector<8x8x32xf32>
    %23 = arith.truncf %22 : vector<8x8x32xf32> to vector<8x8x32xbf16>
    %c0_18 = arith.constant 0 : index
    %c0_19 = arith.constant 0 : index
    %c0_20 = arith.constant 0 : index
    %24 = vector.load %arg6[%c0_18, %c0_19, %c0_20] : memref<8x8x8xbf16, #tpu.memory_space<vmem>>, vector<8x8x8xbf16>
    "tpu.trace_start"() <{level = 10 : i32, message = "bij,bjd->bid"}> : () -> ()
    %cst_21 = arith.constant dense<0.000000e+00> : vector<8x8x32xf32>
    %25 = tpu.matmul %24, %23, %cst_21 {dimension_numbers = #tpu.dot_dimension_numbers<[2], [1], [1], [2], [0, 0, 0, 1, 1, 2], [0], [0]>} : vector<8x8x8xbf16>, vector<8x8x32xbf16>, vector<8x8x32xf32> -> vector<8x8x32xf32>
    "tpu.trace_stop"() : () -> ()
    %26 = vector.shape_cast %25 : vector<8x8x32xf32> to vector<64x32xf32>
    %27 = vector.broadcast %20 : vector<1x32xf32> to vector<64x32xf32>
    %28 = arith.addf %26, %27 : vector<64x32xf32>
    %29 = arith.truncf %28 : vector<64x32xf32> to vector<64x32xbf16>
    %c56 = arith.constant 56 : index
    %c0_22 = arith.constant 0 : index
    %30 = vector.load %arg3[%c56, %c0_22] : memref<120x128xf32, #tpu.memory_space<vmem>>, vector<32x16xf32>
    %31 = arith.truncf %30 : vector<32x16xf32> to vector<32x16xbf16>
    %c88 = arith.constant 88 : index
    %c0_23 = arith.constant 0 : index
    %32 = vector.load %arg3[%c88, %c0_23] : memref<120x128xf32, #tpu.memory_space<vmem>>, vector<1x16xf32>
    %cst_24 = arith.constant dense<0.000000e+00> : vector<64x16xf32>
    %33 = tpu.matmul %29, %31, %cst_24 {dimension_numbers = #tpu.dot_dimension_numbers<[1], [0], [0], [1], [0, 0, 1, 1], [], []>} : vector<64x32xbf16>, vector<32x16xbf16>, vector<64x16xf32> -> vector<64x16xf32>
    %34 = vector.shape_cast %33 : vector<64x16xf32> to vector<8x8x16xf32>
    %35 = arith.truncf %34 : vector<8x8x16xf32> to vector<8x8x16xbf16>
    %c0_25 = arith.constant 0 : index
    %c0_26 = arith.constant 0 : index
    %c0_27 = arith.constant 0 : index
    %36 = vector.load %arg6[%c0_25, %c0_26, %c0_27] : memref<8x8x8xbf16, #tpu.memory_space<vmem>>, vector<8x8x8xbf16>
    "tpu.trace_start"() <{level = 10 : i32, message = "bij,bjd->bid"}> : () -> ()
    %cst_28 = arith.constant dense<0.000000e+00> : vector<8x8x16xf32>
    %37 = tpu.matmul %36, %35, %cst_28 {dimension_numbers = #tpu.dot_dimension_numbers<[2], [1], [1], [2], [0, 0, 0, 1, 1, 2], [0], [0]>} : vector<8x8x8xbf16>, vector<8x8x16xbf16>, vector<8x8x16xf32> -> vector<8x8x16xf32>
    "tpu.trace_stop"() : () -> ()
    %38 = vector.shape_cast %37 : vector<8x8x16xf32> to vector<64x16xf32>
    %39 = vector.broadcast %32 : vector<1x16xf32> to vector<64x16xf32>
    %40 = arith.addf %38, %39 : vector<64x16xf32>
    %41 = arith.truncf %40 : vector<64x16xf32> to vector<64x16xbf16>
    %c96 = arith.constant 96 : index
    %c0_29 = arith.constant 0 : index
    %42 = vector.load %arg3[%c96, %c0_29] : memref<120x128xf32, #tpu.memory_space<vmem>>, vector<16x8xf32>
    %43 = arith.truncf %42 : vector<16x8xf32> to vector<16x8xbf16>
    %c112 = arith.constant 112 : index
    %c0_30 = arith.constant 0 : index
    %44 = vector.load %arg3[%c112, %c0_30] : memref<120x128xf32, #tpu.memory_space<vmem>>, vector<1x8xf32>
    %cst_31 = arith.constant dense<0.000000e+00> : vector<64x8xf32>
    %45 = tpu.matmul %41, %43, %cst_31 {dimension_numbers = #tpu.dot_dimension_numbers<[1], [0], [0], [1], [0, 0, 1, 1], [], []>} : vector<64x16xbf16>, vector<16x8xbf16>, vector<64x8xf32> -> vector<64x8xf32>
    %46 = vector.broadcast %44 : vector<1x8xf32> to vector<64x8xf32>
    %47 = arith.addf %45, %46 : vector<64x8xf32>
    %48 = arith.negf %47 : vector<64x8xf32>
    %49 = math.exp %48 : vector<64x8xf32>
    %cst_32 = arith.constant 1.000000e+00 : f32
    %50 = vector.broadcast %cst_32 : f32 to vector<64x8xf32>
    %51 = arith.addf %50, %49 : vector<64x8xf32>
    %52 = arith.divf %50, %51 : vector<64x8xf32>
    %53 = vector.shape_cast %52 : vector<64x8xf32> to vector<8x8x8xf32>
    %54 = vector.shape_cast %41 : vector<64x16xbf16> to vector<8x8x16xbf16>
    "tpu.trace_start"() <{level = 10 : i32, message = "bnd,bmd->bnm"}> : () -> ()
    %cst_33 = arith.constant dense<0.000000e+00> : vector<8x8x8xf32>
    %55 = tpu.matmul %54, %54, %cst_33 {dimension_numbers = #tpu.dot_dimension_numbers<[2], [2], [1], [1], [0, 0, 0, 1, 1, 1], [0], [0]>} : vector<8x8x16xbf16>, vector<8x8x16xbf16>, vector<8x8x8xf32> -> vector<8x8x8xf32>
    "tpu.trace_stop"() : () -> ()
    %56 = arith.negf %55 : vector<8x8x8xf32>
    %57 = math.exp %56 : vector<8x8x8xf32>
    %cst_34 = arith.constant 1.000000e+00 : f32
    %58 = vector.broadcast %cst_34 : f32 to vector<8x8x8xf32>
    %59 = arith.addf %58, %57 : vector<8x8x8xf32>
    %60 = arith.divf %58, %59 : vector<8x8x8xf32>
    %61 = tpu.concatenate %53, %60 in 2 : vector<8x8x8xf32>, vector<8x8x8xf32> -> vector<8x8x16xf32>
    %62 = vector.extract_strided_slice %61 {offsets = [0, 0, 0], sizes = [8, 1, 16], strides = [1, 1, 1]} : vector<8x8x16xf32> to vector<8x1x16xf32>
    %63 = vector.shape_cast %62 : vector<8x1x16xf32> to vector<8x16xf32>
    %64 = vector.extract_strided_slice %61 {offsets = [0, 1, 0], sizes = [8, 1, 16], strides = [1, 1, 1]} : vector<8x8x16xf32> to vector<8x1x16xf32>
    %65 = vector.shape_cast %64 : vector<8x1x16xf32> to vector<8x16xf32>
    %66 = vector.extract_strided_slice %61 {offsets = [0, 2, 0], sizes = [8, 1, 16], strides = [1, 1, 1]} : vector<8x8x16xf32> to vector<8x1x16xf32>
    %67 = vector.shape_cast %66 : vector<8x1x16xf32> to vector<8x16xf32>
    %68 = vector.extract_strided_slice %61 {offsets = [0, 3, 0], sizes = [8, 1, 16], strides = [1, 1, 1]} : vector<8x8x16xf32> to vector<8x1x16xf32>
    %69 = vector.shape_cast %68 : vector<8x1x16xf32> to vector<8x16xf32>
    %70 = vector.extract_strided_slice %61 {offsets = [0, 4, 0], sizes = [8, 1, 16], strides = [1, 1, 1]} : vector<8x8x16xf32> to vector<8x1x16xf32>
    %71 = vector.shape_cast %70 : vector<8x1x16xf32> to vector<8x16xf32>
    %72 = vector.extract_strided_slice %61 {offsets = [0, 5, 0], sizes = [8, 1, 16], strides = [1, 1, 1]} : vector<8x8x16xf32> to vector<8x1x16xf32>
    %73 = vector.shape_cast %72 : vector<8x1x16xf32> to vector<8x16xf32>
    %74 = vector.extract_strided_slice %61 {offsets = [0, 6, 0], sizes = [8, 1, 16], strides = [1, 1, 1]} : vector<8x8x16xf32> to vector<8x1x16xf32>
    %75 = vector.shape_cast %74 : vector<8x1x16xf32> to vector<8x16xf32>
    %76 = vector.extract_strided_slice %61 {offsets = [0, 7, 0], sizes = [8, 1, 16], strides = [1, 1, 1]} : vector<8x8x16xf32> to vector<8x1x16xf32>
    %77 = vector.shape_cast %76 : vector<8x1x16xf32> to vector<8x16xf32>
    %78 = tpu.concatenate %63, %65, %67, %69, %71, %73, %75, %77 in 1 : vector<8x16xf32>, vector<8x16xf32>, vector<8x16xf32>, vector<8x16xf32>, vector<8x16xf32>, vector<8x16xf32>, vector<8x16xf32>, vector<8x16xf32> -> vector<8x128xf32>
    %79 = arith.truncf %78 : vector<8x128xf32> to vector<8x128xbf16>
    %c0_35 = arith.constant 0 : index
    %c0_36 = arith.constant 0 : index
    %80 = vector.load %arg4[%c0_35, %c0_36] : memref<8x128xbf16, #tpu.memory_space<vmem>>, vector<8x128xbf16>
    tpu.vector_store %arg4[%c0_35, %c0_36], %79 {strides = array<i32>} : memref<8x128xbf16, #tpu.memory_space<vmem>>, vector<8x128xbf16>,
    %81 = vector.shape_cast %40 : vector<64x16xf32> to vector<8x8x16xf32>
    %82 = vector.extract_strided_slice %81 {offsets = [0, 0, 0], sizes = [8, 1, 16], strides = [1, 1, 1]} : vector<8x8x16xf32> to vector<8x1x16xf32>
    %83 = vector.shape_cast %82 : vector<8x1x16xf32> to vector<8x16xf32>
    %84 = vector.extract_strided_slice %81 {offsets = [0, 1, 0], sizes = [8, 1, 16], strides = [1, 1, 1]} : vector<8x8x16xf32> to vector<8x1x16xf32>
    %85 = vector.shape_cast %84 : vector<8x1x16xf32> to vector<8x16xf32>
    %86 = vector.extract_strided_slice %81 {offsets = [0, 2, 0], sizes = [8, 1, 16], strides = [1, 1, 1]} : vector<8x8x16xf32> to vector<8x1x16xf32>
    %87 = vector.shape_cast %86 : vector<8x1x16xf32> to vector<8x16xf32>
    %88 = vector.extract_strided_slice %81 {offsets = [0, 3, 0], sizes = [8, 1, 16], strides = [1, 1, 1]} : vector<8x8x16xf32> to vector<8x1x16xf32>
    %89 = vector.shape_cast %88 : vector<8x1x16xf32> to vector<8x16xf32>
    %90 = vector.extract_strided_slice %81 {offsets = [0, 4, 0], sizes = [8, 1, 16], strides = [1, 1, 1]} : vector<8x8x16xf32> to vector<8x1x16xf32>
    %91 = vector.shape_cast %90 : vector<8x1x16xf32> to vector<8x16xf32>
    %92 = vector.extract_strided_slice %81 {offsets = [0, 5, 0], sizes = [8, 1, 16], strides = [1, 1, 1]} : vector<8x8x16xf32> to vector<8x1x16xf32>
    %93 = vector.shape_cast %92 : vector<8x1x16xf32> to vector<8x16xf32>
    %94 = vector.extract_strided_slice %81 {offsets = [0, 6, 0], sizes = [8, 1, 16], strides = [1, 1, 1]} : vector<8x8x16xf32> to vector<8x1x16xf32>
    %95 = vector.shape_cast %94 : vector<8x1x16xf32> to vector<8x16xf32>
    %96 = vector.extract_strided_slice %81 {offsets = [0, 7, 0], sizes = [8, 1, 16], strides = [1, 1, 1]} : vector<8x8x16xf32> to vector<8x1x16xf32>
    %97 = vector.shape_cast %96 : vector<8x1x16xf32> to vector<8x16xf32>
    %98 = tpu.concatenate %83, %85, %87, %89, %91, %93, %95, %97 in 1 : vector<8x16xf32>, vector<8x16xf32>, vector<8x16xf32>, vector<8x16xf32>, vector<8x16xf32>, vector<8x16xf32>, vector<8x16xf32>, vector<8x16xf32> -> vector<8x128xf32>
    %c0_37 = arith.constant 0 : index
    %c0_38 = arith.constant 0 : index
    %99 = vector.load %arg5[%c0_37, %c0_38] : memref<8x128xf32, #tpu.memory_space<vmem>>, vector<8x128xf32>
    tpu.vector_store %arg5[%c0_37, %c0_38], %98 {strides = array<i32>} : memref<8x128xf32, #tpu.memory_space<vmem>>, vector<8x128xf32>,
    return
  }
  func.func @transform_0(%arg0: i32) -> (i32, i32, i32) {
    %c0_i32 = arith.constant 0 : i32
    %c0_i32_0 = arith.constant 0 : i32
    %c0_i32_1 = arith.constant 0 : i32
    return %arg0, %c0_i32, %c0_i32_0 : i32, i32, i32
  }
  func.func @transform_1(%arg0: i32) -> (i32, i32, i32) {
    %c0_i32 = arith.constant 0 : i32
    %c0_i32_0 = arith.constant 0 : i32
    %c0_i32_1 = arith.constant 0 : i32
    return %arg0, %c0_i32, %c0_i32_0 : i32, i32, i32
  }
  func.func @transform_2(%arg0: i32) -> (i32, i32) {
    %c0_i32 = arith.constant 0 : i32
    %c0_i32_0 = arith.constant 0 : i32
    %c0_i32_1 = arith.constant 0 : i32
    return %c0_i32, %c0_i32_0 : i32, i32
  }
  func.func @transform_3(%arg0: i32) -> (i32, i32) {
    %c0_i32 = arith.constant 0 : i32
    %c0_i32_0 = arith.constant 0 : i32
    return %arg0, %c0_i32 : i32, i32
  }
  func.func @transform_4(%arg0: i32) -> (i32, i32) {
    %c0_i32 = arith.constant 0 : i32
    %c0_i32_0 = arith.constant 0 : i32
    return %arg0, %c0_i32 : i32, i32
  }
}

</mosaic_0001>

<bundles_post_ra>
// kernel: tpu_custom_call.1
= control target key start
LH: loop header
LB: loop body
LE: loop exit
PB: predicated region body
PF: predicated region fallthrough
CT: control target
= control target key end

     0   :  { %10 = vsyncpa [#allocation4], 0  ;;  %s4173_s0 = inlined_call_operand.vmem [shape: bf16[16,8,8], index: 0, kind: input, shape index: {}]   ;;  %s4174_s1 = inlined_call_operand.vmem [shape: s8[16,8,8], index: 1, kind: input, shape index: {}]   ;;  %s4175_s2 = inlined_call_operand.vmem [shape: f32[120,128], index: 2, kind: input, shape index: {}]   ;;  %s4176_s3 = inlined_call_operand.hbm [shape: bf16[16,128], index: 3, kind: output, shape index: {0}]   ;;  %s4177_s4 = inlined_call_operand.hbm [shape: f32[16,128], index: 4, kind: output, shape index: {1}]  }
   0x1   :  { %12 = vsyncpa [#allocation4 + $0x1], 0 }
   0x2   :  { %13 = vsyncpa [#allocation6], 0 }
   0x3   :  { %15 = vsyncpa [#allocation6 + $0x1], 0  ;;  %s3471_s15 = smov 0   ;;  %s3473_s16 = smov 0  }
   0x4   :  { %s3475_s17 = smov 0   ;;  %s3477_s18 = smov 0  }
   0x5 LB: > { %s3492_s19 = sadd.s32 4294967295, %s3432_s18   ;;  %s2773_s20 = sadd.s32 4294967294, %s3432_s18   ;;  %s3432_s18 = sphi %s3477_s18, %s4183_s18   ;;  %s3428_s17 = sphi %s3475_s17, %s4182_s17   ;;  %s3424_s16 = sphi %s3473_s16, %s4181_s16   ;;  %s3420_s15 = sphi %s3471_s15, %s4180_s15  }
   0x6   : > { %s3496_s21 = sadd.s32 1, %s3432_s18   ;;  %s101_s22 = sadd.s32 1, %s3428_s17 }
   0x7   : > { %s98_s23 = ssub.s32 %s3432_s18, %s3496_s21  ;;  %p111_p0 = scmp.ne.s32.totalorder %s3428_s17, %s3424_s16 }
   0x8   : > { %p99_p1 = scmp.eq.s32.totalorder %s98_s23, 0  ;;  %p112_p2 = scmp.eq.s32.totalorder %s3492_s19, 1 }
   0x9   : > { %p117_p3 = scmp.ne.s32.totalorder %s3424_s16, %s3420_s15  ;;  %p118_p4 = scmp.eq.s32.totalorder %s2773_s20, 1 }
   0xa   : > { %s3507_s24 = scalar_select %p99_p1, %s3428_s17, %s101_s22  }
   0xb   : > { %p3509_p5 = por %p112_p2, %p111_p0  ;;  %p3513_p6 = por %p118_p4, %p117_p3 }
   0xc   : > { %p2776_p7 = scmp.ge.s32.totalorder %s3432_s18, 1  ;;  %p183_p8 = scmp.lt.s32.totalorder %s3432_s18, 3 }
   0xe   : > { %p184_p9 = pnand %p2776_p7, %p183_p8 }
   0xf   : > { %s2779_s29 = sshll.u32 (!%p184_p9), %s3492_s19, 3  ;;  %s3437_s5 = smov (!%p184_p9), 16  }
  0x10   : > { %187 = sbr.rel (%p184_p9) target bundleno = 1832 (0x728), region = 32  ;;  %p220_p10 = scmp.lt.s32.totalorder (!%p184_p9), %s2779_s29, 15 }
  0x11   : > { %s3438_s6 = smov (!%p184_p9), 32   ;;  %s3442_s12 = smov (!%p184_p9), 80  }
  0x12   : > { %s3443_s13 = smov (!%p184_p9), 112   ;;  %s4076_s14 = sand.u32 (!%p184_p9), 1, %s3424_s16  }
  0x13   : > { %s2777_s20 = sshll.u32 (!%p184_p9), %s4076_s14, 2  ;;  %s2778_s22 = sshll.u32 (!%p184_p9), %s4076_s14, 3 }
  0x14   : > { %s2865_s23 = sshll.u32 (!%p184_p9), %s3492_s19, 6  ;;  %s211_s27 = scalar_lea.vmem (!%p184_p9), [#allocation3], %s2777_s20 }
  0x15   : > { %v265_v0 = vld [vmem:[%s4175_s2] sm:$0xff]  ;;  %vm301_vm0 = vcmask 1043456   ;;  %s4185_s29 = smov (!%p220_p10, %s2779_s29), 15  ;;  %vm288_vm1 = vcmask 64512   ;;  %vm248_vm2 = vcmask 60416   ;;  %v3434_v23 = vmov 0.0  }
  0x16   : > { %v266_v1 = vpack.c.bf16 %v265_v0, %v265_v0  ;;  %s2780_s30 = sshll.u32 %s4185_s29, 2  ;;  %s2782_s8 = sshll.u32 %s4185_s29, 1  ;;  %2973 = vmatprep.subr.bf16.mxu1 %v3434_v23  ;;  %vm3435_vm3 = vmmov 0   ;;  %v772_v56 = vld [vmem:[%s4175_s2 + $0x20] sm:$0xff]  ;;  %v773_v57 = vld [vmem:[%s4175_s2 + $0x28] sm:$0xff]  ;;  %v770_v59 = vld [vmem:[%s4175_s2 + $0x10] sm:$0xff] }
  0x17   : > { %s223_s7 = scalar_lea.vmem %s4173_s0, %s2780_s30  ;;  %s229_s11 = scalar_lea.vmem %s4174_s1, %s2782_s8  ;;  %2975 = vmatprep.mubr.msk.bf16.mxu1 %vm3435_vm3, %v3434_v23  ;;  %v775_v58 = vpack.c.bf16 %v773_v57, %v772_v56  ;;  %v771_v60 = vld [vmem:[%s4175_s2 + $0x18] sm:$0xff]  ;;  %vm777_vm4 = vcmask 261120   ;;  %vm1747_vm5 = vcmask 130048   ;;  %vm2334_vm6 = vcmask 1041409  }
  0x18   : > { %3199 = vmatprep.subr.msk.bf16.mxu0 %vm301_vm0, %v266_v1  ;;  %v303_v2 = vsel %vm301_vm0, %v266_v1, 0  ;;  %v3274_v3 = vld [vmem:[%s223_s7] sm:$0xff]   ;;  %v3275_v4 = vld [vmem:[%s223_s7 + $0x8] sm:$0xff]   ;;  %v3276_v5 = vld [vmem:[%s223_s7 + $0x10] sm:$0xff]   ;;  %v774_v61 = vpack.c.bf16 %v771_v60, %v770_v59  ;;  %vm2337_vm7 = vcmask 1042434   ;;  %vm2340_vm8 = vcmask 1043459  }
  0x19   : > { %2964 = vmatpush3.bf16.msra.mxu0 %v303_v2  ;;  %2965 = vmatprep.mubr.msk.bf16.mxu0 %vm288_vm1, %v3274_v3  ;;  %v3277_v6 = vld [vmem:[%s223_s7 + $0x18] sm:$0xff]   ;;  %v233_v7 = vld [vmem:[%s229_s11 + $0x2] sm:$0x3]  ;;  %v234_v8 = vld [vmem:[%s229_s11 + $0x4] sm:$0x3]  ;;  %vm2343_vm9 = vcmask 1044484  }
  0x1a   : > { %v235_v9 = vld [vmem:[%s229_s11 + $0x6] sm:$0x3]  ;;  %v236_v10 = vld [vmem:[%s229_s11 + $0x8] sm:$0x3]  ;;  %v237_v11 = vld [vmem:[%s229_s11 + $0xa] sm:$0x3]  ;;  %v241_v14 = vunpack.c.l.s8.bf16 %v233_v7  ;;  %v242_v15 = vunpack.c.l.s8.bf16 %v234_v8  ;;  %2985 = vmatprep.subr.bf16.mxu0 %v3434_v23 }
  0x1b   : > { %v238_v12 = vld [vmem:[%s229_s11 + $0xc] sm:$0x3]  ;;  %v239_v13 = vld [vmem:[%s229_s11 + $0xe] sm:$0x3]  ;;  %v243_v16 = vunpack.c.l.s8.bf16 %v235_v9  ;;  %v244_v17 = vunpack.c.l.s8.bf16 %v236_v10  ;;  %v245_v18 = vunpack.c.l.s8.bf16 %v237_v11  ;;  %v232_v21 = vld [vmem:[%s229_s11] sm:$0x3] }
  0x1c   : > { %2966 = vmatmul.mubr.msk.bf16.vlgmr.msra.gmra.mxu0 %vm288_vm1, %v3275_v4  ;;  %v246_v19 = vunpack.c.l.s8.bf16 %v238_v12  ;;  %v247_v20 = vunpack.c.l.s8.bf16 %v239_v13  ;;  %v240_v22 = vunpack.c.l.s8.bf16 %v232_v21  ;;  %250 = vst.msk [vmem:[#allocation2 + $0x4] sm:$0xf] %vm248_vm2, %v241_v14  ;;  %251 = vst.msk [vmem:[#allocation2 + $0x8] sm:$0xf] %vm248_vm2, %v242_v15  ;;  %vm2346_vm10 = vcmask 1045509   ;;  %s3436_s30 = smov 8  }
  0x1d   : > { %2969 = vmatprep.mubr.msk.bf16.mxu0 %vm288_vm1, %v3276_v5  ;;  %252 = vst.msk [vmem:[#allocation2 + $0xc] sm:$0xf] %vm248_vm2, %v243_v16  ;;  %253 = vst.msk [vmem:[#allocation2 + $0x10] sm:$0xf] %vm248_vm2, %v244_v17  ;;  %v2799_v5 = vld [vmem:[%s4175_s2 + $0x8] ss:$0 sm:$0xff] }
  0x1e   : > { %249 = vst.msk [vmem:[#allocation2] sm:$0xf] %vm248_vm2, %v240_v22  ;;  %254 = vst.msk [vmem:[#allocation2 + $0x14] sm:$0xf] %vm248_vm2, %v245_v18  ;;  %vm2349_vm11 = vcmask 1046534   ;;  %vm2352_vm12 = vcmask 1047559  }
  0x1f   : > { %255 = vst.msk [vmem:[#allocation2 + $0x18] sm:$0xf] %vm248_vm2, %v246_v19  ;;  %256 = vst.msk [vmem:[#allocation2 + $0x1c] sm:$0xf] %vm248_vm2, %v247_v20  ;;  %s3439_s7 = smov 48   ;;  %s3440_s8 = smov 64  }
  0x20   : > { %s3441_s11 = smov 96   ;;  %vm2476_vm13 = vcmask 392192   ;;  %vm2478_vm14 = vcmask 523264   ;;  %vm2480_vm15 = vcmask 654336   ;;  %s2657_s28 = sshll.u32 %s211_s27, 4  ;;  %s4100_s28 = int_to_ptr.vmem [resolvable:$true] %s2657_s28 }
  0x21   : > { %s2866_s29 = sshll.u32 %s3492_s19, 7 }
  0x22   : > { %s4107_s10 = scalar_lea.hbm %s4177_s4, %s2866_s29 }
  0x23   : > { %v380_v30 = vld [vmem:[#allocation2 + $0x8] sm:$0xf]  ;;  %v379_v43 = vld [vmem:[#allocation2 + $0x4] sm:$0xf] }
  0x24   : > { %2970 = vmatmul.mubr.msk.bf16.gmra.mxu0 %vm288_vm1, %v3277_v6  ;;  %v382_v44 = vld [vmem:[#allocation2 + $0x10] sm:$0xf]  ;;  %v381_v49 = vld [vmem:[#allocation2 + $0xc] sm:$0xf]  ;;  %v864_v57 = vld [vmem:[#allocation2 + $0x4] sm:$0xf] }
  0x25   : > { %2987 = vmatprep.mubr.msk.bf16.mxu0 %vm3435_vm3, %v3434_v23  ;;  %v378_v33 = vld [vmem:[#allocation2] sm:$0xf]  ;;  %v383_v53 = vld [vmem:[#allocation2 + $0x14] sm:$0xf] }
  0x26   : > { %v384_v50 = vld [vmem:[#allocation2 + $0x18] sm:$0xf]  ;;  %v385_v55 = vld [vmem:[#allocation2 + $0x1c] sm:$0xf] }
  0xdc   : > { %v2967_v24 = vpop.f32.mrf.mxu0 }
  0xdd   : > { %v372_v25 = vpack.c.bf16 %v2967_v24, %v2967_v24 }
  0xde   : > { %v339_v26 = vpop.f32.mrf.mxu0 }
  0xdf   : > { %v482_v27 = vsel %vm301_vm0, %v372_v25, 0  ;;  %v370_v28 = vpack.c.bf16 %v339_v26, %v339_v26 }
  0xe0   : > { %v2968_v29 = vpop.f32.mrf.mxu0  ;;  %2986 = vmatpush3.bf16.msra.mxu0 %v482_v27 }
  0xe1   : > { %v390_v31 = vsel %vm301_vm0, %v370_v28, 0  ;;  %2997 = vmatprep.subr.bf16.mxu0 %v3434_v23  ;;  %v373_v41 = vpack.c.bf16 %v2968_v29, %v2968_v29 }
  0xe2   : > { %v342_v32 = vpop.f32.mrf.mxu0  ;;  %2974 = vmatpush3.bf16.msra.mxu1 %v390_v31 }
  0xe3   : > { %v371_v34 = vpack.c.bf16 %v342_v32, %v342_v32  ;;  %2979 = vmatprep.subr.bf16.mxu1 %v3434_v23  ;;  %2988 = vmatmul.mubr.msk.bf16.vlgmr.msra.gmra.mxu0 %vm288_vm1, %v380_v30  ;;  %v528_v47 = vsel %vm301_vm0, %v373_v41, 0 }
  0xe4   : > { %v2971_v35 = vpop.f32.mrf.mxu0  ;;  %2999 = vmatprep.mubr.msk.bf16.mxu0 %vm3435_vm3, %v3434_v23 }
  0xe5   : > { %v436_v36 = vsel %vm301_vm0, %v371_v34, 0  ;;  %2976 = vmatmul.mubr.msk.bf16.vlgmr.msra.gmra.mxu1 %vm288_vm1, %v378_v33  ;;  %v376_v39 = vpack.c.bf16 %v2971_v35, %v2971_v35 }
  0xe6   : > { %2980 = vmatpush3.bf16.msra.mxu1 %v436_v36  ;;  %2981 = vmatprep.mubr.msk.bf16.mxu1 %vm3435_vm3, %v3434_v23  ;;  %v355_v37 = vpop.f32.mrf.mxu0 }
  0xe7   : > { %2991 = vmatprep.subr.bf16.mxu1 %v3434_v23  ;;  %v374_v38 = vpack.c.bf16 %v355_v37, %v355_v37  ;;  %v666_v45 = vsel %vm301_vm0, %v376_v39, 0 }
  0xe8   : > { %v2972_v40 = vpop.f32.mrf.mxu0 }
  0xe9   : > { %v574_v42 = vsel %vm301_vm0, %v374_v38, 0  ;;  %v377_v52 = vpack.c.bf16 %v2972_v40, %v2972_v40 }
  0xea   : > { %2998 = vmatpush3.bf16.msra.mxu0 %v574_v42  ;;  %v358_v46 = vpop.f32.mrf.mxu0 }
  0xeb   : > { %3009 = vmatprep.subr.bf16.mxu0 %v3434_v23  ;;  %v375_v48 = vpack.c.bf16 %v358_v46, %v358_v46  ;;  %v712_v54 = vsel %vm301_vm0, %v377_v52, 0 }
  0xed   : > { %2982 = vmatmul.mubr.msk.bf16.vlgmr.msra.gmra.mxu1 %vm288_vm1, %v379_v43  ;;  %3000 = vmatmul.mubr.msk.bf16.vlgmr.msra.gmra.mxu0 %vm288_vm1, %v382_v44  ;;  %v620_v51 = vsel %vm301_vm0, %v375_v48, 0 }
  0xee   : > { %2992 = vmatpush3.bf16.msra.mxu1 %v528_v47  ;;  %2993 = vmatprep.mubr.msk.bf16.mxu1 %vm3435_vm3, %v3434_v23 }
  0xef   : > { %3003 = vmatprep.subr.bf16.mxu1 %v3434_v23  ;;  %3010 = vmatpush3.bf16.msra.mxu0 %v666_v45 }
  0xf0   : > { %3011 = vmatprep.mubr.msk.bf16.mxu0 %vm3435_vm3, %v3434_v23  ;;  %3021 = vmatprep.subr.bf16.mxu0 %v775_v58 }
  0xf5   : > { %2994 = vmatmul.mubr.msk.bf16.vlgmr.msra.gmra.mxu1 %vm288_vm1, %v381_v49  ;;  %3012 = vmatmul.mubr.msk.bf16.vlgmr.msra.gmra.mxu0 %vm288_vm1, %v384_v50  ;;  %v865_v50 = vld [vmem:[#allocation2 + $0x8] sm:$0xf] }
  0xf6   : > { %3004 = vmatpush3.bf16.msra.mxu1 %v620_v51  ;;  %3005 = vmatprep.mubr.msk.bf16.mxu1 %vm3435_vm3, %v3434_v23 }
  0xf7   : > { %3015 = vmatprep.subr.bf16.mxu1 %v3434_v23  ;;  %3022 = vmatpush3.bf16.msra.mxu0 %v775_v58 }
  0xf8   : > { %3023 = vmatprep.subr.bf16.mxu0 %v774_v61 }
  0xfb   : > { %3024 = vmatpush3.bf16.msra.mxu0 %v774_v61 }
  0xfc   : > { %3045 = vmatprep.subr.bf16.mxu0 %v3434_v23 }
  0xfd   : > { %3006 = vmatmul.mubr.msk.bf16.vlgmr.msra.gmra.mxu1 %vm288_vm1, %v383_v53  ;;  %v863_v53 = vld [vmem:[#allocation2] sm:$0xf] }
  0xfe   : > { %3016 = vmatpush3.bf16.msra.mxu1 %v712_v54  ;;  %3017 = vmatprep.mubr.msk.bf16.mxu1 %vm3435_vm3, %v3434_v23 }
  0xff   : > { %3033 = vmatprep.subr.bf16.mxu1 %v3434_v23 }
 0x105   : > { %3018 = vmatmul.mubr.msk.bf16.vlgmr.msra.gmra.mxu1 %vm288_vm1, %v385_v55 }
 0x106   : > { %3035 = vmatprep.mubr.msk.bf16.mxu1 %vm3435_vm3, %v3434_v23 }
 0x1a3   : > { %v518_v62 = vpop.f32.mrf.mxu0 }
 0x1a4   : > { %v760_v18 = vadd.f32 %v2799_v5, %v518_v62 }
 0x1a5   : > { %v426_v63 = vpop.f32.mrf.mxu1  ;;  %v2989_v0 = vpop.f32.mrf.mxu0 }
 0x1a6   : > { %v758_v9 = vadd.f32 %v2799_v5, %v426_v63 }
 0x1a7   : > { %v2977_v1 = vpop.f32.mrf.mxu1  ;;  %v521_v2 = vpop.f32.mrf.mxu0 }
 0x1a8   : > { %v866_v2 = vld [vmem:[#allocation2 + $0xc] sm:$0xf] }
 0x1a9   : > { %v429_v3 = vpop.f32.mrf.mxu1  ;;  %v2990_v4 = vpop.f32.mrf.mxu0 }
 0x1aa   : > { %v867_v3 = vld [vmem:[#allocation2 + $0x10] sm:$0xf] }
 0x1ab   : > { %v2978_v6 = vpop.f32.mrf.mxu1 }
 0x1ad   : > { %v472_v7 = vpop.f32.mrf.mxu1  ;;  %v610_v8 = vpop.f32.mrf.mxu0 }
 0x1ae   : > { %v759_v10 = vadd.f32 %v2799_v5, %v472_v7  ;;  %v762_v30 = vadd.f32 %v2799_v5, %v610_v8  ;;  %v868_v8 = vld [vmem:[#allocation2 + $0x14] sm:$0xf] }
 0x1af   : > { %v2983_v11 = vpop.f32.mrf.mxu1  ;;  %v3001_v12 = vpop.f32.mrf.mxu0 }
 0x1b0   : > { %v766_v13 = vpack.c.bf16 %v759_v10, %v758_v9  ;;  %v869_v9 = vld [vmem:[#allocation2 + $0x18] sm:$0xf]  ;;  %v870_v11 = vld [vmem:[#allocation2 + $0x1c] sm:$0xf]  ;;  %v1257_v12 = vld [vmem:[%s4175_s2 + $0x48] sm:$0xff] }
 0x1b1   : > { %v475_v14 = vpop.f32.mrf.mxu1  ;;  %v613_v15 = vpop.f32.mrf.mxu0 }
 0x1b2   : > { %3025 = vmatprep.mubr.msk.bf16.mxu0 %vm777_vm4, %v766_v13  ;;  %v1258_v13 = vld [vmem:[%s4175_s2 + $0x50] sm:$0xff]  ;;  %v1255_v15 = vld [vmem:[%s4175_s2 + $0x38] sm:$0xff] }
 0x1b3   : > { %v2984_v16 = vpop.f32.mrf.mxu1  ;;  %v3002_v17 = vpop.f32.mrf.mxu0  ;;  %v1260_v14 = vpack.c.bf16 %v1258_v13, %v1257_v12  ;;  %v1348_v13 = vld [vmem:[#allocation2 + $0x4] sm:$0xf] }
 0x1b4   : > { %v1256_v16 = vld [vmem:[%s4175_s2 + $0x40] sm:$0xff] }
 0x1b5   : > { %v564_v19 = vpop.f32.mrf.mxu1  ;;  %v702_v20 = vpop.f32.mrf.mxu0  ;;  %v1259_v17 = vpack.c.bf16 %v1256_v16, %v1255_v15 }
 0x1b6   : > { %v761_v21 = vadd.f32 %v2799_v5, %v564_v19  ;;  %v764_v37 = vadd.f32 %v2799_v5, %v702_v20 }
 0x1b7   : > { %v2995_v22 = vpop.f32.mrf.mxu1  ;;  %v3013_v24 = vpop.f32.mrf.mxu0 }
 0x1b8   : > { %v767_v25 = vpack.c.bf16 %v761_v21, %v760_v18 }
 0x1b9   : > { %v567_v26 = vpop.f32.mrf.mxu1  ;;  %v705_v27 = vpop.f32.mrf.mxu0 }
 0x1ba   : > { %3026 = vmatmul.mubr.msk.bf16.vlgmr.msra.gmra.mxu0 %vm777_vm4, %v767_v25  ;;  %v2812_v26 = vld [vmem:[%s4175_s2 + $0x30] ss:$0 sm:$0xff] }
 0x1bb   : > { %v2996_v28 = vpop.f32.mrf.mxu1  ;;  %v3014_v29 = vpop.f32.mrf.mxu0 }
 0x1bd   : > { %v656_v31 = vpop.f32.mrf.mxu1 }
 0x1be   : > { %v763_v32 = vadd.f32 %v2799_v5, %v656_v31 }
 0x1bf   : > { %v3007_v33 = vpop.f32.mrf.mxu1 }
 0x1c0   : > { %v768_v34 = vpack.c.bf16 %v763_v32, %v762_v30 }
 0x1c1   : > { %v659_v35 = vpop.f32.mrf.mxu1 }
 0x1c2   : > { %3029 = vmatprep.mubr.msk.bf16.mxu0 %vm777_vm4, %v768_v34 }
 0x1c3   : > { %v3008_v36 = vpop.f32.mrf.mxu1 }
 0x1c5   : > { %v748_v38 = vpop.f32.mrf.mxu1 }
 0x1c6   : > { %v765_v39 = vadd.f32 %v2799_v5, %v748_v38 }
 0x1c7   : > { %v3019_v40 = vpop.f32.mrf.mxu1 }
 0x1c8   : > { %v769_v41 = vpack.c.bf16 %v765_v39, %v764_v37 }
 0x1c9   : > { %v751_v42 = vpop.f32.mrf.mxu1 }
 0x1ca   : > { %3030 = vmatmul.mubr.msk.bf16.gmra.mxu0 %vm777_vm4, %v769_v41 }
 0x1cb   : > { %v3020_v43 = vpop.f32.mrf.mxu1  ;;  %3047 = vmatprep.mubr.msk.bf16.mxu0 %vm3435_vm3, %v3434_v23 }
 0x27a   : > { %v3027_v44 = vpop.f32.mrf.mxu0 }
 0x27b   : > { %v857_v45 = vpack.c.bf16 %v3027_v44, %v3027_v44 }
 0x27c   : > { %v824_v46 = vpop.f32.mrf.mxu0 }
 0x27d   : > { %v967_v47 = vsel %vm301_vm0, %v857_v45, 0  ;;  %v855_v48 = vpack.c.bf16 %v824_v46, %v824_v46 }
 0x27e   : > { %v3028_v49 = vpop.f32.mrf.mxu0  ;;  %3046 = vmatpush3.bf16.msra.mxu0 %v967_v47 }
 0x27f   : > { %v875_v51 = vsel %vm301_vm0, %v855_v48, 0  ;;  %3057 = vmatprep.subr.bf16.mxu0 %v3434_v23  ;;  %v858_v56 = vpack.c.bf16 %v3028_v49, %v3028_v49 }
 0x280   : > { %v827_v52 = vpop.f32.mrf.mxu0  ;;  %3034 = vmatpush3.bf16.msra.mxu1 %v875_v51 }
 0x281   : > { %v856_v54 = vpack.c.bf16 %v827_v52, %v827_v52  ;;  %3039 = vmatprep.subr.bf16.mxu1 %v3434_v23  ;;  %3048 = vmatmul.mubr.msk.bf16.vlgmr.msra.gmra.mxu0 %vm288_vm1, %v865_v50  ;;  %v1013_v59 = vsel %vm301_vm0, %v858_v56, 0 }
 0x282   : > { %3059 = vmatprep.mubr.msk.bf16.mxu0 %vm3435_vm3, %v3434_v23 }
 0x283   : > { %v921_v55 = vsel %vm301_vm0, %v856_v54, 0  ;;  %3036 = vmatmul.mubr.msk.bf16.vlgmr.msra.gmra.mxu1 %vm288_vm1, %v863_v53 }
 0x284   : > { %3040 = vmatpush3.bf16.msra.mxu1 %v921_v55  ;;  %3041 = vmatprep.mubr.msk.bf16.mxu1 %vm3435_vm3, %v3434_v23 }
 0x285   : > { %3051 = vmatprep.subr.bf16.mxu1 %v3434_v23 }
 0x28a   : > { %v3031_v58 = vpop.f32.mrf.mxu0 }
 0x28b   : > { %3042 = vmatmul.mubr.msk.bf16.vlgmr.msra.gmra.mxu1 %vm288_vm1, %v864_v57  ;;  %v861_v61 = vpack.c.bf16 %v3031_v58, %v3031_v58 }
 0x28c   : > { %3052 = vmatpush3.bf16.msra.mxu1 %v1013_v59  ;;  %v840_v60 = vpop.f32.mrf.mxu0  ;;  %3053 = vmatprep.mubr.msk.bf16.mxu1 %vm3435_vm3, %v3434_v23 }
 0x28d   : > { %v859_v62 = vpack.c.bf16 %v840_v60, %v840_v60  ;;  %3063 = vmatprep.subr.bf16.mxu1 %v3434_v23  ;;  %v1151_v4 = vsel %vm301_vm0, %v861_v61, 0 }
 0x28e   : > { %v3032_v63 = vpop.f32.mrf.mxu0 }
 0x28f   : > { %v1059_v0 = vsel %vm301_vm0, %v859_v62, 0  ;;  %v862_v7 = vpack.c.bf16 %v3032_v63, %v3032_v63 }
 0x290   : > { %v843_v1 = vpop.f32.mrf.mxu0  ;;  %3058 = vmatpush3.bf16.msra.mxu0 %v1059_v0 }
 0x291   : > { %v860_v5 = vpack.c.bf16 %v843_v1, %v843_v1  ;;  %3069 = vmatprep.subr.bf16.mxu0 %v3434_v23  ;;  %v1197_v10 = vsel %vm301_vm0, %v862_v7, 0 }
 0x293   : > { %v1105_v6 = vsel %vm301_vm0, %v860_v5, 0  ;;  %3054 = vmatmul.mubr.msk.bf16.vlgmr.msra.gmra.mxu1 %vm288_vm1, %v866_v2  ;;  %3060 = vmatmul.mubr.msk.bf16.vlgmr.msra.gmra.mxu0 %vm288_vm1, %v867_v3 }
 0x294   : > { %3064 = vmatpush3.bf16.msra.mxu1 %v1105_v6  ;;  %3070 = vmatpush3.bf16.msra.mxu0 %v1151_v4  ;;  %v1349_v6 = vld [vmem:[#allocation2 + $0x8] sm:$0xf] }
 0x295   : > { %3065 = vmatprep.mubr.msk.bf16.mxu1 %vm3435_vm3, %v3434_v23  ;;  %3075 = vmatprep.subr.bf16.mxu1 %v3434_v23 }
 0x296   : > { %3071 = vmatprep.mubr.msk.bf16.mxu0 %vm3435_vm3, %v3434_v23  ;;  %3081 = vmatprep.subr.bf16.mxu0 %v1260_v14 }
 0x29b   : > { %3066 = vmatmul.mubr.msk.bf16.vlgmr.msra.gmra.mxu1 %vm288_vm1, %v868_v8  ;;  %3072 = vmatmul.mubr.msk.bf16.vlgmr.msra.gmra.mxu0 %vm288_vm1, %v869_v9  ;;  %v1347_v9 = vld [vmem:[#allocation2] sm:$0xf] }
 0x29c   : > { %3076 = vmatpush3.bf16.msra.mxu1 %v1197_v10  ;;  %3077 = vmatprep.mubr.msk.bf16.mxu1 %vm3435_vm3, %v3434_v23 }
 0x29d   : > { %3093 = vmatprep.subr.bf16.mxu1 %v3434_v23  ;;  %3082 = vmatpush3.bf16.msra.mxu0 %v1260_v14 }
 0x29e   : > { %3083 = vmatprep.subr.bf16.mxu0 %v1259_v17 }
 0x2a1   : > { %3084 = vmatpush3.bf16.msra.mxu0 %v1259_v17 }
 0x2a2   : > { %3105 = vmatprep.subr.bf16.mxu0 %v3434_v23 }
 0x2a3   : > { %3078 = vmatmul.mubr.msk.bf16.vlgmr.msra.gmra.mxu1 %vm288_vm1, %v870_v11 }
 0x2a4   : > { %3095 = vmatprep.mubr.msk.bf16.mxu1 %vm3435_vm3, %v3434_v23 }
 0x341   : > { %v1003_v18 = vpop.f32.mrf.mxu0 }
 0x342   : > { %v1245_v35 = vadd.f32 %v2812_v26, %v1003_v18 }
 0x343   : > { %v911_v19 = vpop.f32.mrf.mxu1  ;;  %v3049_v20 = vpop.f32.mrf.mxu0 }
 0x344   : > { %v1243_v29 = vadd.f32 %v2812_v26, %v911_v19 }
 0x345   : > { %v3037_v21 = vpop.f32.mrf.mxu1  ;;  %v1006_v22 = vpop.f32.mrf.mxu0 }
 0x346   : > { %v1350_v22 = vld [vmem:[#allocation2 + $0xc] sm:$0xf] }
 0x347   : > { %v914_v24 = vpop.f32.mrf.mxu1  ;;  %v3050_v25 = vpop.f32.mrf.mxu0 }
 0x348   : > { %v1351_v24 = vld [vmem:[#allocation2 + $0x10] sm:$0xf] }
 0x349   : > { %v3038_v27 = vpop.f32.mrf.mxu1 }
 0x34b   : > { %v957_v28 = vpop.f32.mrf.mxu1 }
 0x34c   : > { %v1244_v30 = vadd.f32 %v2812_v26, %v957_v28 }
 0x34d   : > { %v3043_v31 = vpop.f32.mrf.mxu1 }
 0x34e   : > { %v1251_v32 = vpack.c.bf16 %v1244_v30, %v1243_v29  ;;  %v1352_v29 = vld [vmem:[#allocation2 + $0x14] sm:$0xf]  ;;  %v1353_v30 = vld [vmem:[#allocation2 + $0x18] sm:$0xf] }
 0x34f   : > { %v960_v33 = vpop.f32.mrf.mxu1 }
 0x350   : > { %3085 = vmatprep.mubr.msk.bf16.mxu0 %vm777_vm4, %v1251_v32  ;;  %v1354_v32 = vld [vmem:[#allocation2 + $0x1c] sm:$0xf]  ;;  %v1739_v33 = vld [vmem:[%s4175_s2 + $0x60] sm:$0xff] }
 0x351   : > { %v3044_v34 = vpop.f32.mrf.mxu1 }
 0x352   : > { %v1740_v34 = vld [vmem:[%s4175_s2 + $0x68] sm:$0xff] }
 0x353   : > { %v1049_v36 = vpop.f32.mrf.mxu1  ;;  %v1095_v37 = vpop.f32.mrf.mxu0 }
 0x354   : > { %v1246_v38 = vadd.f32 %v2812_v26, %v1049_v36  ;;  %v1247_v46 = vadd.f32 %v2812_v26, %v1095_v37  ;;  %v3706_v36 = vld [vmem:[%s4175_s2 + $0x58] ss:$0 sm:$0xff] }
 0x355   : > { %v3055_v39 = vpop.f32.mrf.mxu1  ;;  %v3061_v40 = vpop.f32.mrf.mxu0 }
 0x356   : > { %v1252_v41 = vpack.c.bf16 %v1246_v38, %v1245_v35  ;;  %v1741_v35 = vpack.c.bf16 %v1740_v34, %v1739_v33 }
 0x357   : > { %v1052_v42 = vpop.f32.mrf.mxu1  ;;  %v1098_v43 = vpop.f32.mrf.mxu0 }
 0x358   : > { %3086 = vmatmul.mubr.msk.bf16.vlgmr.msra.gmra.mxu0 %vm777_vm4, %v1252_v41 }
 0x359   : > { %v3056_v44 = vpop.f32.mrf.mxu1  ;;  %v3062_v45 = vpop.f32.mrf.mxu0 }
 0x35b   : > { %v1141_v47 = vpop.f32.mrf.mxu1  ;;  %v1187_v48 = vpop.f32.mrf.mxu0 }
 0x35c   : > { %v1248_v49 = vadd.f32 %v2812_v26, %v1141_v47  ;;  %v1249_v57 = vadd.f32 %v2812_v26, %v1187_v48 }
 0x35d   : > { %v3067_v50 = vpop.f32.mrf.mxu1  ;;  %v3073_v51 = vpop.f32.mrf.mxu0 }
 0x35e   : > { %v1253_v52 = vpack.c.bf16 %v1248_v49, %v1247_v46 }
 0x35f   : > { %v1144_v53 = vpop.f32.mrf.mxu1  ;;  %v1190_v54 = vpop.f32.mrf.mxu0 }
 0x360   : > { %3089 = vmatprep.mubr.msk.bf16.mxu0 %vm777_vm4, %v1253_v52 }
 0x361   : > { %v3068_v55 = vpop.f32.mrf.mxu1  ;;  %v3074_v56 = vpop.f32.mrf.mxu0 }
 0x363   : > { %v1233_v58 = vpop.f32.mrf.mxu1 }
 0x364   : > { %v1250_v59 = vadd.f32 %v2812_v26, %v1233_v58 }
 0x365   : > { %v3079_v60 = vpop.f32.mrf.mxu1 }
 0x366   : > { %v1254_v61 = vpack.c.bf16 %v1250_v59, %v1249_v57 }
 0x367   : > { %v1236_v62 = vpop.f32.mrf.mxu1 }
 0x368   : > { %3090 = vmatmul.mubr.msk.bf16.gmra.mxu0 %vm777_vm4, %v1254_v61 }
 0x369   : > { %v3080_v63 = vpop.f32.mrf.mxu1  ;;  %3107 = vmatprep.mubr.msk.bf16.mxu0 %vm3435_vm3, %v3434_v23 }
 0x418   : > { %v3087_v0 = vpop.f32.mrf.mxu0 }
 0x419   : > { %v1341_v1 = vpack.c.bf16 %v3087_v0, %v3087_v0 }
 0x41a   : > { %v1308_v2 = vpop.f32.mrf.mxu0 }
 0x41b   : > { %v1451_v3 = vsel %vm301_vm0, %v1341_v1, 0  ;;  %v1339_v4 = vpack.c.bf16 %v1308_v2, %v1308_v2 }
 0x41c   : > { %v3088_v5 = vpop.f32.mrf.mxu0  ;;  %3106 = vmatpush3.bf16.msra.mxu0 %v1451_v3 }
 0x41d   : > { %v1359_v7 = vsel %vm301_vm0, %v1339_v4, 0  ;;  %3117 = vmatprep.subr.bf16.mxu0 %v3434_v23  ;;  %v1342_v12 = vpack.c.bf16 %v3088_v5, %v3088_v5 }
 0x41e   : > { %v1311_v8 = vpop.f32.mrf.mxu0  ;;  %3094 = vmatpush3.bf16.msra.mxu1 %v1359_v7 }
 0x41f   : > { %v1340_v10 = vpack.c.bf16 %v1311_v8, %v1311_v8  ;;  %3099 = vmatprep.subr.bf16.mxu1 %v3434_v23  ;;  %3108 = vmatmul.mubr.msk.bf16.vlgmr.msra.gmra.mxu0 %vm288_vm1, %v1349_v6  ;;  %v1497_v15 = vsel %vm301_vm0, %v1342_v12, 0 }
 0x420   : > { %3119 = vmatprep.mubr.msk.bf16.mxu0 %vm3435_vm3, %v3434_v23 }
 0x421   : > { %v1405_v11 = vsel %vm301_vm0, %v1340_v10, 0  ;;  %3096 = vmatmul.mubr.msk.bf16.vlgmr.msra.gmra.mxu1 %vm288_vm1, %v1347_v9 }
 0x422   : > { %3100 = vmatpush3.bf16.msra.mxu1 %v1405_v11  ;;  %3101 = vmatprep.mubr.msk.bf16.mxu1 %vm3435_vm3, %v3434_v23 }
 0x423   : > { %3111 = vmatprep.subr.bf16.mxu1 %v3434_v23 }
 0x428   : > { %v3091_v14 = vpop.f32.mrf.mxu0 }
 0x429   : > { %3102 = vmatmul.mubr.msk.bf16.vlgmr.msra.gmra.mxu1 %vm288_vm1, %v1348_v13  ;;  %v1345_v19 = vpack.c.bf16 %v3091_v14, %v3091_v14 }
 0x42a   : > { %3112 = vmatpush3.bf16.msra.mxu1 %v1497_v15  ;;  %v1324_v16 = vpop.f32.mrf.mxu0  ;;  %3113 = vmatprep.mubr.msk.bf16.mxu1 %vm3435_vm3, %v3434_v23 }
 0x42b   : > { %v1343_v17 = vpack.c.bf16 %v1324_v16, %v1324_v16  ;;  %3123 = vmatprep.subr.bf16.mxu1 %v3434_v23  ;;  %v1635_v26 = vsel %vm301_vm0, %v1345_v19, 0 }
 0x42c   : > { %v3092_v18 = vpop.f32.mrf.mxu0 }
 0x42d   : > { %v1543_v20 = vsel %vm301_vm0, %v1343_v17, 0  ;;  %v1346_v28 = vpack.c.bf16 %v3092_v18, %v3092_v18 }
 0x42e   : > { %v1327_v21 = vpop.f32.mrf.mxu0  ;;  %3118 = vmatpush3.bf16.msra.mxu0 %v1543_v20 }
 0x42f   : > { %v1344_v25 = vpack.c.bf16 %v1327_v21, %v1327_v21  ;;  %3129 = vmatprep.subr.bf16.mxu0 %v3434_v23  ;;  %v1681_v31 = vsel %vm301_vm0, %v1346_v28, 0 }
 0x431   : > { %v1589_v27 = vsel %vm301_vm0, %v1344_v25, 0  ;;  %3114 = vmatmul.mubr.msk.bf16.vlgmr.msra.gmra.mxu1 %vm288_vm1, %v1350_v22  ;;  %3120 = vmatmul.mubr.msk.bf16.vlgmr.msra.gmra.mxu0 %vm288_vm1, %v1351_v24  ;;  %vm2482_vm0 = vcmask 785408  }
 0x432   : > { %3124 = vmatpush3.bf16.msra.mxu1 %v1589_v27  ;;  %3130 = vmatpush3.bf16.msra.mxu0 %v1635_v26 }
 0x433   : > { %3125 = vmatprep.mubr.msk.bf16.mxu1 %vm3435_vm3, %v3434_v23  ;;  %3131 = vmatprep.mubr.msk.bf16.mxu0 %vm3435_vm3, %v3434_v23 }
 0x434   : > { %3135 = vmatprep.subr.bf16.mxu1 %v3434_v23  ;;  %3141 = vmatprep.subr.bf16.mxu0 %v1741_v35 }
 0x439   : > { %3126 = vmatmul.mubr.msk.bf16.vlgmr.msra.gmra.mxu1 %vm288_vm1, %v1352_v29  ;;  %3132 = vmatmul.mubr.msk.bf16.vlgmr.msra.gmra.mxu0 %vm288_vm1, %v1353_v30 }
 0x43a   : > { %3136 = vmatpush3.bf16.msra.mxu1 %v1681_v31  ;;  %3137 = vmatprep.mubr.msk.bf16.mxu1 %vm3435_vm3, %v3434_v23 }
 0x43b   : > { %3151 = vmatprep.subr.bf16.mxu1 %v3434_v23  ;;  %3142 = vmatpush3.bf16.msra.mxu0 %v1741_v35 }
 0x43c   : > { %3163 = vmatprep.subr.bf16.mxu0 %v3434_v23 }
 0x441   : > { %3138 = vmatmul.mubr.msk.bf16.vlgmr.msra.gmra.mxu1 %vm288_vm1, %v1354_v32 }
 0x442   : > { %3153 = vmatprep.mubr.msk.bf16.mxu1 %vm3435_vm3, %v3434_v23 }
 0x4df   : > { %v1487_v37 = vpop.f32.mrf.mxu0 }
 0x4e0   : > { %v3714_v44 = vadd.f32 %v3706_v36, %v1487_v37 }
 0x4e1   : > { %v1395_v38 = vpop.f32.mrf.mxu1  ;;  %v3109_v39 = vpop.f32.mrf.mxu0 }
 0x4e2   : > { %v3709_v40 = vadd.f32 %v3706_v36, %v1395_v38  ;;  %v3720_v49 = vpack.c.bf16 %v3714_v44, %v3714_v44  ;;  %v2513_v50 = vrot.slane %v3714_v44, 7  ;;  %v2548_v51 = vrot.slane %v3714_v44, 1 }
 0x4e3   : > { %v3097_v41 = vpop.f32.mrf.mxu1  ;;  %v1490_v42 = vpop.f32.mrf.mxu0  ;;  %v2565_v52 = vrot.slane %v3714_v44, 2  ;;  %v2498_v55 = vrot.slane %v3714_v44, 6  ;;  %v2582_v56 = vrot.slane %v3714_v44, 3  ;;  %v2616_v57 = vrot.slane %v3714_v44, 5 }
 0x4e4   : > { %v2869_v43 = vpack.c.bf16 %v3709_v40, %v3709_v40  ;;  %v2511_v54 = vrot.slane %v3709_v40, 1  ;;  %v2528_v59 = vrot.slane %v3709_v40, 2  ;;  %v2545_v60 = vrot.slane %v3709_v40, 3 }
 0x4e5   : > { %v1398_v45 = vpop.f32.mrf.mxu1  ;;  %v3110_v46 = vpop.f32.mrf.mxu0  ;;  %v2562_v61 = vrot.slane %v3709_v40, 4  ;;  %v2579_v63 = vrot.slane %v3709_v40, 5  ;;  %v2613_v0 = vrot.slane %v3709_v40, 7  ;;  %v2596_v1 = vrot.slane %v3709_v40, 6 }
 0x4e6   : > { %v1894_v47 = vsel %vm1747_vm5, %v2869_v43, 0  ;;  %v2599_v2 = vrot.slane %v3714_v44, 4  ;;  %v1980_v41 = vsel %vm1747_vm5, %v3720_v49, 0 }
 0x4e7   : > { %v3098_v48 = vpop.f32.mrf.mxu1  ;;  %3152 = vmatpush3.bf16.xpose.msra.mxu1 %v1894_v47 }
 0x4e8   : > { %3157 = vmatprep.subr.bf16.mxu1 %v3434_v23 }
 0x4e9   : > { %v1441_v53 = vpop.f32.mrf.mxu1 }
 0x4ea   : > { %v1728_v58 = vadd.f32 %v3706_v36, %v1441_v53 }
 0x4eb   : > { %v3103_v62 = vpop.f32.mrf.mxu1 }
 0x4ec   : > { %v1735_v3 = vpack.c.bf16 %v1728_v58, %v3709_v40  ;;  %v2870_v4 = vpack.c.bf16 %v1728_v58, %v1728_v58  ;;  %v2512_v5 = vsel %vm2334_vm6, %v1728_v58, %v2511_v54  ;;  %v2529_v6 = vrot.slane %v1728_v58, 1 }
 0x4ed   : > { %v1444_v7 = vpop.f32.mrf.mxu1  ;;  %v2514_v8 = vsel %vm2337_vm7, %v2513_v50, %v2512_v5  ;;  %v2546_v9 = vrot.slane %v1728_v58, 2  ;;  %v2563_v10 = vrot.slane %v1728_v58, 3  ;;  %v2496_v11 = vrot.slane %v1728_v58, 7 }
 0x4ee   : > { %3143 = vmatprep.mubr.msk.bf16.mxu0 %vm1747_vm5, %v1735_v3  ;;  %3154 = vmatmul.mubr.msk.bf16.vlgmr.msra.gmra.mxu1 %vm1747_vm5, %v2869_v43  ;;  %v1937_v12 = vsel %vm1747_vm5, %v2870_v4, 0  ;;  %v2530_v13 = vsel %vm2334_vm6, %v2529_v6, %v2528_v59  ;;  %v2580_v14 = vrot.slane %v1728_v58, 4  ;;  %v2614_v15 = vrot.slane %v1728_v58, 6 }
 0x4ef   : > { %v3104_v16 = vpop.f32.mrf.mxu1  ;;  %3158 = vmatpush3.bf16.xpose.msra.mxu1 %v1937_v12  ;;  %3159 = vmatprep.mubr.msk.bf16.mxu1 %vm3435_vm3, %v3434_v23  ;;  %v2531_v17 = vsel %vm2337_vm7, %v3714_v44, %v2530_v13  ;;  %v2547_v18 = vsel %vm2334_vm6, %v2546_v9, %v2545_v60  ;;  %v2564_v19 = vsel %vm2334_vm6, %v2563_v10, %v2562_v61  ;;  %v2597_v20 = vrot.slane %v1728_v58, 5 }
 0x4f0   : > { %3169 = vmatprep.subr.bf16.mxu1 %v3434_v23  ;;  %v2549_v21 = vsel %vm2337_vm7, %v2548_v51, %v2547_v18  ;;  %v2566_v22 = vsel %vm2337_vm7, %v2565_v52, %v2564_v19  ;;  %v2497_v24 = vsel %vm2334_vm6, %v2496_v11, %v3709_v40  ;;  %v2581_v25 = vsel %vm2334_vm6, %v2580_v14, %v2579_v63 }
 0x4f1   : > { %v1533_v26 = vpop.f32.mrf.mxu1  ;;  %v1579_v27 = vpop.f32.mrf.mxu0  ;;  %v2499_v28 = vsel %vm2337_vm7, %v2498_v55, %v2497_v24  ;;  %v2583_v29 = vsel %vm2337_vm7, %v2582_v56, %v2581_v25  ;;  %v2615_v30 = vsel %vm2334_vm6, %v2614_v15, %v2613_v0  ;;  %v2598_v31 = vsel %vm2334_vm6, %v2597_v20, %v2596_v1 }
 0x4f2   : > { %v3761_v32 = vadd.f32 %v3706_v36, %v1533_v26  ;;  %v3764_v33 = vadd.f32 %v3706_v36, %v1579_v27  ;;  %v2617_v34 = vsel %vm2337_vm7, %v2616_v57, %v2615_v30  ;;  %v3768_v35 = vsel %vm2337_vm7, %v2599_v2, %v2598_v31 }
 0x4f3   : > { %v3115_v37 = vpop.f32.mrf.mxu1  ;;  %v3121_v38 = vpop.f32.mrf.mxu0 }
 0x4f4   : > { %v1736_v39 = vpack.c.bf16 %v3761_v32, %v3714_v44  ;;  %v2872_v40 = vpack.c.bf16 %v3761_v32, %v3761_v32  ;;  %v2515_v42 = vrot.slane %v3761_v32, 6  ;;  %v2517_v46 = vrot.slane %v3764_v33, 5 }
 0x4f5   : > { %v1536_v43 = vpop.f32.mrf.mxu1  ;;  %v1582_v45 = vpop.f32.mrf.mxu0  ;;  %v2532_v47 = vrot.slane %v3761_v32, 7  ;;  %v2534_v48 = vrot.slane %v3764_v33, 6  ;;  %v2550_v50 = vsel %vm2340_vm8, %v3761_v32, %v2549_v21  ;;  %v2551_v52 = vrot.slane %v3764_v33, 7 }
 0x4f6   : > { %3144 = vmatmul.mubr.msk.bf16.vlgmr.msra.gmra.mxu0 %vm1747_vm5, %v1736_v39  ;;  %3160 = vmatmul.mubr.msk.bf16.vlgmr.msra.gmra.mxu1 %vm1747_vm5, %v2870_v4  ;;  %v2023_v44 = vsel %vm1747_vm5, %v2872_v40, 0  ;;  %v2516_v51 = vsel %vm2340_vm8, %v2515_v42, %v2514_v8  ;;  %v2567_v57 = vrot.slane %v3761_v32, 1  ;;  %v2500_v58 = vrot.slane %v3761_v32, 5 }
 0x4f7   : > { %v3116_v53 = vpop.f32.mrf.mxu1  ;;  %v3122_v54 = vpop.f32.mrf.mxu0  ;;  %3170 = vmatpush3.bf16.xpose.msra.mxu1 %v2023_v44  ;;  %3164 = vmatpush3.bf16.xpose.msra.mxu0 %v1980_v41  ;;  %v2518_v55 = vsel %vm2343_vm9, %v2517_v46, %v2516_v51  ;;  %v2533_v56 = vsel %vm2340_vm8, %v2532_v47, %v2531_v17  ;;  %v2552_v60 = vsel %vm2343_vm9, %v2551_v52, %v2550_v50  ;;  %v2502_v61 = vrot.slane %v3764_v33, 4 }
 0x4f8   : > { %3171 = vmatprep.mubr.msk.bf16.mxu1 %vm3435_vm3, %v3434_v23  ;;  %3181 = vmatprep.subr.bf16.mxu1 %v3434_v23  ;;  %v2535_v59 = vsel %vm2343_vm9, %v2534_v48, %v2533_v56  ;;  %v2584_v62 = vrot.slane %v3761_v32, 2  ;;  %v2568_v1 = vsel %vm2340_vm8, %v2567_v57, %v2566_v22  ;;  %v2501_v2 = vsel %vm2340_vm8, %v2500_v58, %v2499_v28 }
 0x4f9   : > { %v1625_v63 = vpop.f32.mrf.mxu1  ;;  %v1671_v0 = vpop.f32.mrf.mxu0  ;;  %3175 = vmatprep.subr.bf16.mxu0 %v3434_v23  ;;  %v2618_v3 = vrot.slane %v3761_v32, 4  ;;  %v2569_v6 = vsel %vm2343_vm9, %v3764_v33, %v2568_v1  ;;  %v2503_v7 = vsel %vm2343_vm9, %v2502_v61, %v2501_v2  ;;  %v2586_v11 = vrot.slane %v3764_v33, 1 }
 0x4fa   : > { %v3803_v4 = vadd.f32 %v3706_v36, %v1625_v63  ;;  %v3806_v5 = vadd.f32 %v3706_v36, %v1671_v0  ;;  %v2585_v10 = vsel %vm2340_vm8, %v2584_v62, %v2583_v29  ;;  %v2620_v16 = vrot.slane %v3764_v33, 3 }
 0x4fb   : > { %v3127_v8 = vpop.f32.mrf.mxu1  ;;  %v3133_v9 = vpop.f32.mrf.mxu0  ;;  %v2619_v12 = vsel %vm2340_vm8, %v2618_v3, %v2617_v34  ;;  %v2601_v27 = vrot.slane %v3761_v32, 3  ;;  %v2587_v45 = vsel %vm2343_vm9, %v2586_v11, %v2585_v10 }
 0x4fc   : > { %v2874_v13 = vpack.c.bf16 %v3803_v4, %v3803_v4  ;;  %v1737_v14 = vpack.c.bf16 %v3803_v4, %v3764_v33  ;;  %v2519_v15 = vrot.slane %v3803_v4, 4  ;;  %v2521_v19 = vrot.slane %v3806_v5, 3 }
 0x4fd   : > { %v1628_v17 = vpop.f32.mrf.mxu1  ;;  %v1674_v18 = vpop.f32.mrf.mxu0  ;;  %v2536_v20 = vrot.slane %v3803_v4, 5  ;;  %v2538_v21 = vrot.slane %v3806_v5, 4  ;;  %v2553_v22 = vrot.slane %v3803_v4, 6  ;;  %v2555_v26 = vrot.slane %v3806_v5, 5 }
 0x4fe   : > { %3172 = vmatmul.mubr.msk.bf16.vlgmr.msra.gmra.mxu1 %vm1747_vm5, %v2872_v40  ;;  %v2109_v24 = vsel %vm1747_vm5, %v2874_v13, 0  ;;  %3147 = vmatprep.mubr.msk.bf16.mxu0 %vm1747_vm5, %v1737_v14  ;;  %v2520_v25 = vsel %vm2346_vm10, %v2519_v15, %v2518_v55  ;;  %v2570_v37 = vrot.slane %v3803_v4, 7  ;;  %v2572_v39 = vrot.slane %v3806_v5, 6 }
 0x4ff   : > { %v3128_v28 = vpop.f32.mrf.mxu1  ;;  %3182 = vmatpush3.bf16.xpose.msra.mxu1 %v2109_v24  ;;  %3183 = vmatprep.mubr.msk.bf16.mxu1 %vm3435_vm3, %v3434_v23  ;;  %v3134_v29 = vpop.f32.mrf.mxu0  ;;  %v2522_v30 = vsel %vm2349_vm11, %v2521_v19, %v2520_v25  ;;  %v2537_v31 = vsel %vm2346_vm10, %v2536_v20, %v2535_v59  ;;  %v2554_v34 = vsel %vm2346_vm10, %v2553_v22, %v2552_v60  ;;  %v2504_v40 = vrot.slane %v3803_v4, 3 }
 0x500   : > { %3193 = vmatprep.subr.bf16.mxu1 %v3434_v23  ;;  %v2539_v38 = vsel %vm2349_vm11, %v2538_v21, %v2537_v31  ;;  %v2556_v32 = vsel %vm2349_vm11, %v2555_v26, %v2554_v34  ;;  %v2571_v42 = vsel %vm2346_vm10, %v2570_v37, %v2569_v6  ;;  %v2506_v43 = vrot.slane %v3806_v5, 2 }
 0x501   : > { %v1717_v41 = vpop.f32.mrf.mxu1  ;;  %v2589_v46 = vrot.slane %v3806_v5, 7  ;;  %v2573_v48 = vsel %vm2349_vm11, %v2572_v39, %v2571_v42  ;;  %v2505_v50 = vsel %vm2346_vm10, %v2504_v40, %v2503_v7  ;;  %v2588_v44 = vsel %vm2346_vm10, %v3803_v4, %v2587_v45 }
 0x502   : > { %v1734_v47 = vadd.f32 %v3706_v36, %v1717_v41  ;;  %v2507_v52 = vsel %vm2349_vm11, %v2506_v43, %v2505_v50  ;;  %v2621_v54 = vsel %vm2343_vm9, %v2620_v16, %v2619_v12  ;;  %v2622_v55 = vrot.slane %v3803_v4, 2 }
 0x503   : > { %v3139_v51 = vpop.f32.mrf.mxu1  ;;  %v2590_v53 = vsel %vm2349_vm11, %v2589_v46, %v2588_v44  ;;  %v2624_v10 = vrot.slane %v3806_v5, 1  ;;  %v2602_v12 = vsel %vm2340_vm8, %v2601_v27, %v3768_v35  ;;  %v2605_v14 = vrot.slane %v3803_v4, 1 }
 0x504   : > { %v1738_v56 = vpack.c.bf16 %v1734_v47, %v3806_v5  ;;  %v2876_v57 = vpack.c.bf16 %v1734_v47, %v1734_v47  ;;  %v2523_v36 = vrot.slane %v1734_v47, 2  ;;  %v2540_v58 = vrot.slane %v1734_v47, 3 }
 0x505   : > { %v1720_v59 = vpop.f32.mrf.mxu1  ;;  %v2557_v60 = vrot.slane %v1734_v47, 4  ;;  %v2574_v61 = vrot.slane %v1734_v47, 5  ;;  %v2508_v62 = vrot.slane %v1734_v47, 1  ;;  %v2591_v63 = vrot.slane %v1734_v47, 6 }
 0x506   : > { %3148 = vmatmul.mubr.msk.bf16.gmra.mxu0 %vm1747_vm5, %v1738_v56  ;;  %3184 = vmatmul.mubr.msk.bf16.vlgmr.msra.gmra.mxu1 %vm1747_vm5, %v2874_v13  ;;  %v2195_v0 = vsel %vm1747_vm5, %v2876_v57, 0  ;;  %v3859_v1 = vsel %vm2352_vm12, %v2523_v36, %v2522_v30  ;;  %v3862_v2 = vsel %vm2352_vm12, %v2540_v58, %v2539_v38  ;;  %v2623_v3 = vsel %vm2346_vm10, %v2622_v55, %v2621_v54 }
 0x507   : > { %v3140_v6 = vpop.f32.mrf.mxu1  ;;  %3194 = vmatpush3.bf16.xpose.msra.mxu1 %v2195_v0  ;;  %3165 = vmatprep.mubr.msk.bf16.mxu0 %vm3435_vm3, %v3434_v23  ;;  %v3868_v7 = vsel %vm2352_vm12, %v2557_v60, %v2556_v32  ;;  %v3871_v8 = vsel %vm2352_vm12, %v2574_v61, %v2573_v48  ;;  %v3874_v9 = vsel %vm2352_vm12, %v2508_v62, %v2507_v52  ;;  %v2603_v13 = vrot.slane %v3764_v33, 2 }
 0x508   : > { %3195 = vmatprep.mubr.msk.bf16.mxu1 %vm3435_vm3, %v3434_v23  ;;  %v3880_v11 = vsel %vm2352_vm12, %v2591_v63, %v2590_v53  ;;  %v2625_v15 = vsel %vm2349_vm11, %v2624_v10, %v2623_v3  ;;  %v2608_v16 = vrot.slane %v1734_v47, 7  ;;  %v2873_v17 = vpack.c.bf16 %v3764_v33, %v3764_v33 }
 0x509   : > { %v3890_v18 = vsel %vm2352_vm12, %v1734_v47, %v2625_v15  ;;  %v2604_v19 = vsel %vm2343_vm9, %v2603_v13, %v2602_v12  ;;  %v2875_v33 = vpack.c.bf16 %v3806_v5, %v3806_v5 }
 0x50a   : > { %v2606_v20 = vsel %vm2346_vm10, %v2605_v14, %v2604_v19  ;;  %v2066_v4 = vsel %vm1747_vm5, %v2873_v17, 0 }
 0x50b   : > { %v2607_v35 = vsel %vm2349_vm11, %v3806_v5, %v2606_v20  ;;  %v2152_v22 = vsel %vm1747_vm5, %v2875_v33, 0 }
 0x50c   : > { %v3897_v21 = vsel %vm2352_vm12, %v2608_v16, %v2607_v35 }
 0x50e   : > { %3166 = vmatmul.mubr.msk.bf16.vlgmr.msra.gmra.mxu0 %vm1747_vm5, %v3720_v49  ;;  %3196 = vmatmul.mubr.msk.bf16.vlgmr.msra.gmra.mxu1 %vm1747_vm5, %v2876_v57 }
 0x50f   : > { %3176 = vmatpush3.bf16.xpose.msra.mxu0 %v2066_v4  ;;  %3177 = vmatprep.mubr.msk.bf16.mxu0 %vm3435_vm3, %v3434_v23 }
 0x510   : > { %3187 = vmatprep.subr.bf16.mxu0 %v3434_v23 }
 0x516   : > { %3178 = vmatmul.mubr.msk.bf16.vlgmr.msra.gmra.mxu0 %vm1747_vm5, %v2873_v17 }
 0x517   : > { %3188 = vmatpush3.bf16.xpose.msra.mxu0 %v2152_v22  ;;  %3189 = vmatprep.mubr.msk.bf16.mxu0 %vm3435_vm3, %v3434_v23 }
 0x51e   : > { %3190 = vmatmul.mubr.msk.bf16.vlgmr.msra.gmra.mxu0 %vm1747_vm5, %v2875_v33 }
 0x5ae   : > { %v1930_v49 = vpop.f32.mrf.mxu1 }
 0x5af   : > { %v2855_v24 = vmul.f32 -1.442695, %v1930_v49 }
 0x5b0   : > { %v3155_v25 = vpop.f32.mrf.mxu1 }
 0x5b1   : > { %3278 = vpow2.f32 %v2855_v24 }
 0x5b2   : > { %v1933_v26 = vpop.f32.mrf.mxu1 }
 0x5b4   : > { %v3156_v27 = vpop.f32.mrf.mxu1 }
 0x5b6   : > { %v1973_v28 = vpop.f32.mrf.mxu1  ;;  %v3913_v30 = vpop.f32.mrf.mxu0 }
 0x5b7   : > { %v2856_v29 = vmul.f32 -1.442695, %v1973_v28 }
 0x5b8   : > { %v3161_v5 = vpop.f32.mrf.mxu1  ;;  %v3915_v34 = vpop.f32.mrf.mxu0 }
 0x5b9   : > { %3280 = vpow2.f32 %v2856_v29 }
 0x5ba   : > { %v1976_v31 = vpop.f32.mrf.mxu1  ;;  %v3917_v23 = vpop.f32.mrf.mxu0 }
 0x5bc   : > { %v3162_v37 = vpop.f32.mrf.mxu1  ;;  %v3919_v42 = vpop.f32.mrf.mxu0 }
 0x5be   : > { %v2059_v38 = vpop.f32.mrf.mxu1  ;;  %v3279_v39 = vpop.eup %3278 }
 0x5bf   : > { %v2261_v41 = vadd.f32 1.0, %v3279_v39  ;;  %v2858_v53 = vmul.f32 -1.442695, %v2059_v38 }
 0x5c0   : > { %v3173_v32 = vpop.f32.mrf.mxu1 }
 0x5c1   : > { %3282 = vrcp.f32 %v2261_v41 }
 0x5c2   : > { %v2062_v40 = vpop.f32.mrf.mxu1 }
 0x5c4   : > { %v3174_v43 = vpop.f32.mrf.mxu1 }
 0x5c6   : > { %v3281_v45 = vpop.eup %3280  ;;  %v3921_v46 = vpop.f32.mrf.mxu0 }
 0x5c7   : > { %v2145_v47 = vpop.f32.mrf.mxu1  ;;  %v2262_v48 = vadd.f32 1.0, %v3281_v45 }
 0x5c8   : > { %v3923_v50 = vpop.f32.mrf.mxu0  ;;  %v2860_v36 = vmul.f32 -1.442695, %v2145_v47 }
 0x5c9   : > { %v3185_v44 = vpop.f32.mrf.mxu1  ;;  %3284 = vrcp.f32 %v2262_v48 }
 0x5ca   : > { %v3925_v51 = vpop.f32.mrf.mxu0  ;;  %3286 = vpow2.f32 %v2858_v53 }
 0x5cb   : > { %v2148_v52 = vpop.f32.mrf.mxu1  ;;  %3288 = vpow2.f32 %v2860_v36 }
 0x5cc   : > { %v3927_v54 = vpop.f32.mrf.mxu0  ;;  %v2826_v52 = vld [vmem:[%s4175_s2 + $0x70] ss:$0 sm:$0xff] }
 0x5cd   : > { %v3186_v55 = vpop.f32.mrf.mxu1  ;;  %v1795_v53 = vadd.f32 %v2826_v52, %v3915_v34  ;;  %v1811_v34 = vadd.f32 %v2826_v52, %v3923_v50 }
 0x5ce   : > { %v2016_v56 = vpop.f32.mrf.mxu0  ;;  %v3283_v3 = vpop.eup %3282 }
 0x5cf   : > { %v2231_v57 = vpop.f32.mrf.mxu1  ;;  %v2857_v58 = vmul.f32 -1.442695, %v2016_v56  ;;  %v2831_v55 = vmul.f32 -1.442695, %v1795_v53 }
 0x5d0   : > { %v3167_v59 = vpop.f32.mrf.mxu0  ;;  %v2862_v15 = vmul.f32 -1.442695, %v2231_v57 }
 0x5d1   : > { %v3197_v60 = vpop.f32.mrf.mxu1  ;;  %3290 = vpow2.f32 %v2857_v58  ;;  %v1803_v58 = vadd.f32 %v3913_v30, %v2826_v52 }
 0x5d2   : > { %v2019_v61 = vpop.f32.mrf.mxu0 }
 0x5d3   : > { %v2234_v62 = vpop.f32.mrf.mxu1  ;;  %v2833_v59 = vmul.f32 -1.442695, %v1803_v58  ;;  %v2835_v61 = vmul.f32 -1.442695, %v1811_v34 }
 0x5d4   : > { %v3168_v63 = vpop.f32.mrf.mxu0 }
 0x5d5   : > { %v3198_v0 = vpop.f32.mrf.mxu1  ;;  %v1819_v63 = vadd.f32 %v3921_v46, %v2826_v52 }
 0x5d6   : > { %v3285_v6 = vpop.eup %3284  ;;  %v2102_v10 = vpop.f32.mrf.mxu0  ;;  %v1822_v0 = vadd.f32 %v3925_v51, %v2826_v52 }
 0x5d7   : > { %v2859_v12 = vmul.f32 -1.442695, %v2102_v10  ;;  %v3254_v13 = vpack.i.bf16 %v3285_v6, %v3283_v3  ;;  %v3287_v17 = vpop.eup %3286 }
 0x5d8   : > { %v3179_v14 = vpop.f32.mrf.mxu0  ;;  %v2264_v35 = vadd.f32 1.0, %v3287_v17  ;;  %v3289_v33 = vpop.eup %3288 }
 0x5d9   : > { %3292 = vpow2.f32 %v2859_v12  ;;  %3255 = vrot.lane.b32.xlu0 %v3254_v13, %s3436_s30  ;;  %v2266_v26 = vadd.f32 1.0, %v3289_v33  ;;  %v2837_v12 = vmul.f32 -1.442695, %v1819_v63  ;;  %v2838_v13 = vmul.f32 -1.442695, %v1822_v0 }
 0x5da   : > { %v2105_v16 = vpop.f32.mrf.mxu0  ;;  %3294 = vpow2.f32 %v2862_v15 }
 0x5dc   : > { %v3180_v19 = vpop.f32.mrf.mxu0 }
 0x5de   : > { %v2188_v20 = vpop.f32.mrf.mxu0  ;;  %v3291_v49 = vpop.eup %3290 }
 0x5df   : > { %v2861_v4 = vmul.f32 -1.442695, %v2188_v20  ;;  %v2263_v24 = vadd.f32 1.0, %v3291_v49 }
 0x5e0   : > { %v3191_v22 = vpop.f32.mrf.mxu0 }
 0x5e1   : > { %3296 = vpow2.f32 %v2861_v4 }
 0x5e2   : > { %v2191_v25 = vpop.f32.mrf.mxu0  ;;  %3298 = vrcp.f32 %v2264_v35 }
 0x5e3   : > { %3300 = vrcp.f32 %v2263_v24 }
 0x5e4   : > { %v3192_v27 = vpop.f32.mrf.mxu0  ;;  %3302 = vrcp.f32 %v2266_v26 }
 0x5e6   : > { %v3293_v28 = vpop.eup %3292 }
 0x5e7   : > { %v2265_v29 = vadd.f32 1.0, %v3293_v28  ;;  %v3295_v5 = vpop.eup %3294 }
 0x5e8   : > { %v2268_v31 = vadd.f32 1.0, %v3295_v5 }
 0x5e9   : > { %3304 = vrcp.f32 %v2265_v29 }
 0x5ea   : > { %3306 = vrcp.f32 %v2268_v31 }
 0x5ee   : > { %v3297_v37 = vpop.eup %3296 }
 0x5ef   : > { %v3299_v38 = vpop.eup %3298  ;;  %v2267_v32 = vadd.f32 1.0, %v3297_v37 }
 0x5f0   : > { %v3301_v39 = vpop.eup %3300 }
 0x5f1   : > { %3308 = vrcp.f32 %v2267_v32  ;;  %v3259_v40 = vpack.i.bf16 %v3299_v38, %v3301_v39  ;;  %v3303_v41 = vpop.eup %3302 }
 0x5f2   : > { %3310 = vpow2.f32 %v2831_v55 }
 0x5f3   : > { %3260 = vrot.lane.b32.xlu0 %v3259_v40, %s3436_s30 }
 0x5f6   : > { %v3305_v43 = vpop.eup %3304 }
 0x5f7   : > { %v3264_v45 = vpack.i.bf16 %v3303_v41, %v3305_v43  ;;  %v3307_v47 = vpop.eup %3306 }
 0x5f9   : > { %3265 = vrot.lane.b32.xlu1 %v3264_v45, %s3436_s30 }
 0x5fe   : > { %v3309_v48 = vpop.eup %3308 }
 0x5ff   : > { %v3269_v44 = vpack.i.bf16 %v3307_v47, %v3309_v48 }
 0x601   : > { %3270 = vrot.lane.b32.xlu1 %v3269_v44, %s3436_s30  ;;  %s4091_s30 = scalar_lea.vmem [#allocation5], %s2778_s22 }
 0x605   : > { %2525 = vrot.lane.b32.xlu1 %v3859_v1, %s3437_s5  ;;  %v1798_v1 = vadd.f32 %v2826_v52, %v3919_v42  ;;  %v1814_v42 = vadd.f32 %v2826_v52, %v3927_v54 }
 0x607   : > { %v2832_v56 = vmul.f32 -1.442695, %v1798_v1  ;;  %v2836_v62 = vmul.f32 -1.442695, %v1814_v42 }
 0x609   : > { %2542 = vrot.lane.b32.xlu1 %v3862_v2, %s3438_s6  ;;  %3312 = vpow2.f32 %v2832_v56  ;;  %v3311_v2 = vpop.eup %3310 }
 0x60a   : > { %v1849_v36 = vadd.f32 1.0, %v3311_v2 }
 0x60c   : > { %3314 = vrcp.f32 %v1849_v36 }
 0x60d   : > { %2559 = vrot.lane.b32.xlu1 %v3868_v7, %s3439_s7 }
 0x611   : > { %2576 = vrot.lane.b32.xlu1 %v3871_v8, %s3440_s8  ;;  %v1806_v8 = vadd.f32 %v3917_v23, %v2826_v52 }
 0x613   : > { %v2834_v60 = vmul.f32 -1.442695, %v1806_v8 }
 0x616   : > { %v3313_v57 = vpop.eup %3312 }
 0x617   : > { %v1850_v7 = vadd.f32 1.0, %v3313_v57 }
 0x619   : > { %3316 = vrcp.f32 %v1850_v7  ;;  %v3315_v3 = vpop.eup %3314 }
 0x61a   : > { %3318 = vpow2.f32 %v2833_v59 }
 0x61b   : > { %3320 = vpow2.f32 %v2834_v60 }
 0x61c   : > { %3322 = vpow2.f32 %v2835_v61 }
 0x61d   : > { %3324 = vpow2.f32 %v2836_v62 }
 0x61e   : > { %3326 = vpow2.f32 %v2837_v12 }
 0x61f   : > { %3328 = vpow2.f32 %v2838_v13 }
 0x626   : > { %v3317_v10 = vpop.eup %3316 }
 0x627   : > { %v3319_v27 = vpop.eup %3318 }
 0x628   : > { %v3321_v31 = vpop.eup %3320  ;;  %v1851_v39 = vadd.f32 1.0, %v3319_v27 }
 0x629   : > { %v1852_v40 = vadd.f32 1.0, %v3321_v31  ;;  %v3323_v41 = vpop.eup %3322 }
 0x62a   : > { %v3325_v43 = vpop.eup %3324  ;;  %3330 = vrcp.f32 %v1851_v39  ;;  %v1853_v45 = vadd.f32 1.0, %v3323_v41 }
 0x62b   : > { %3332 = vrcp.f32 %v1852_v40  ;;  %v1854_v47 = vadd.f32 1.0, %v3325_v43  ;;  %v3327_v48 = vpop.eup %3326 }
 0x62c   : > { %3334 = vrcp.f32 %v1853_v45  ;;  %v3329_v44 = vpop.eup %3328  ;;  %v1855_v52 = vadd.f32 1.0, %v3327_v48 }
 0x62d   : > { %3336 = vrcp.f32 %v1854_v47  ;;  %v1856_v53 = vadd.f32 1.0, %v3329_v44 }
 0x62e   : > { %3338 = vrcp.f32 %v1855_v52 }
 0x62f   : > { %3340 = vrcp.f32 %v1856_v53 }
 0x637   : > { %v3331_v55 = vpop.eup %3330 }
 0x638   : > { %v3333_v57 = vpop.eup %3332 }
 0x639   : > { %v3335_v0 = vpop.eup %3334 }
 0x64b   : > { %v3256_v30 = vpop.permute.xlu0 %3255 }
 0x64c   : > { %v3258_v23 = vunpack.i.h.bf16 %v3256_v30  ;;  %v3257_v6 = vunpack.i.l.bf16 %v3256_v30 }
 0x64e   : > { %v2318_v50 = vsel %vm288_vm1, %v3317_v10, %v3258_v23  ;;  %v2317_v54 = vsel %vm288_vm1, %v3315_v3, %v3257_v6  ;;  %v3337_v10 = vpop.eup %3336 }
 0x64f   : > { %v2440_v14 = vrot.slane %v2317_v54, 6  ;;  %v2441_v15 = vrot.slane %v2318_v50, 5  ;;  %v2372_v16 = vrot.slane %v2317_v54, 2  ;;  %v2373_v17 = vrot.slane %v2318_v50, 1  ;;  %v3339_v52 = vpop.eup %3338 }
 0x650   : > { %v2355_v46 = vrot.slane %v2317_v54, 1  ;;  %v2389_v19 = vrot.slane %v2317_v54, 3  ;;  %v2390_v51 = vrot.slane %v2318_v50, 2  ;;  %v2406_v20 = vrot.slane %v2317_v54, 4 }
 0x651   : > { %v2442_v35 = vsel %vm2334_vm6, %v2441_v15, %v2440_v14  ;;  %v2374_v4 = vsel %vm2334_vm6, %v2373_v17, %v2372_v16  ;;  %v2407_v33 = vrot.slane %v2318_v50, 3  ;;  %v2423_v22 = vrot.slane %v2317_v54, 5 }
 0x652   : > { %v2356_v49 = vsel %vm2334_vm6, %v2318_v50, %v2355_v46  ;;  %v2391_v24 = vsel %vm2334_vm6, %v2390_v51, %v2389_v19  ;;  %v2424_v25 = vrot.slane %v2318_v50, 4  ;;  %v2457_v26 = vrot.slane %v2317_v54, 7 }
 0x653   : > { %v2408_v28 = vsel %vm2334_vm6, %v2407_v33, %v2406_v20  ;;  %v2458_v29 = vrot.slane %v2318_v50, 6  ;;  %v2333_v5 = vrot.slane %v2318_v50, 7 }
 0x654   : > { %v3960_v37 = vsel %vm2334_vm6, %v2424_v25, %v2423_v22 }
 0x655   : > { %v3963_v38 = vsel %vm2334_vm6, %v2458_v29, %v2457_v26  ;;  %v3966_v32 = vsel %vm2334_vm6, %v2333_v5, %v2317_v54 }
 0x665   : > { %v3261_v1 = vpop.permute.xlu0 %3260 }
 0x666   : > { %v3263_v56 = vunpack.i.h.bf16 %v3261_v1  ;;  %v3262_v2 = vunpack.i.l.bf16 %v3261_v1 }
 0x668   : > { %v3969_v36 = vsel %vm288_vm1, %v3333_v57, %v3263_v56  ;;  %v3972_v7 = vsel %vm288_vm1, %v3331_v55, %v3262_v2  ;;  %v3341_v2 = vpop.eup %3340 }
 0x669   : > { %v2443_v58 = vrot.slane %v3972_v7, 4  ;;  %v2445_v8 = vrot.slane %v3969_v36, 3  ;;  %v2375_v59 = vsel %vm2337_vm7, %v3972_v7, %v2374_v4  ;;  %v2376_v60 = vrot.slane %v3969_v36, 7 }
 0x66a   : > { %v2357_v42 = vrot.slane %v3972_v7, 7  ;;  %v2359_v61 = vrot.slane %v3969_v36, 6  ;;  %v2392_v62 = vrot.slane %v3972_v7, 1  ;;  %v2409_v63 = vrot.slane %v3972_v7, 2 }
 0x66b   : > { %v3266_v34 = vpop.permute.xlu1 %3265  ;;  %v2444_v23 = vsel %vm2337_vm7, %v2443_v58, %v2442_v35  ;;  %v2377_v6 = vsel %vm2340_vm8, %v2376_v60, %v2375_v59  ;;  %v2411_v25 = vrot.slane %v3969_v36, 1  ;;  %v2426_v41 = vrot.slane %v3972_v7, 3 }
 0x66c   : > { %v3268_v30 = vunpack.i.h.bf16 %v3266_v34  ;;  %v3267_v3 = vunpack.i.l.bf16 %v3266_v34  ;;  %v2446_v12 = vsel %vm2340_vm8, %v2445_v8, %v2444_v23  ;;  %v2358_v13 = vsel %vm2337_vm7, %v2357_v42, %v2356_v49 }
 0x66d   : > { %v2393_v50 = vsel %vm2337_vm7, %v2392_v62, %v2391_v24  ;;  %v2410_v54 = vsel %vm2337_vm7, %v2409_v63, %v2408_v28  ;;  %v2360_v16 = vsel %vm2340_vm8, %v2359_v61, %v2358_v13  ;;  %v2428_v47 = vrot.slane %v3969_v36, 2 }
 0x66e   : > { %v3990_v14 = vsel %vm288_vm1, %v3337_v10, %v3268_v30  ;;  %v3993_v15 = vsel %vm288_vm1, %v3335_v0, %v3267_v3  ;;  %v2394_v17 = vsel %vm2340_vm8, %v3969_v36, %v2393_v50  ;;  %v2412_v40 = vsel %vm2340_vm8, %v2411_v25, %v2410_v54 }
 0x66f   : > { %v2447_v46 = vrot.slane %v3993_v15, 2  ;;  %v2449_v19 = vrot.slane %v3990_v14, 1  ;;  %v2378_v51 = vrot.slane %v3993_v15, 6  ;;  %v2380_v20 = vrot.slane %v3990_v14, 5 }
 0x670   : > { %v2361_v35 = vrot.slane %v3993_v15, 5  ;;  %v2363_v4 = vrot.slane %v3990_v14, 4  ;;  %v2395_v33 = vrot.slane %v3993_v15, 7  ;;  %v2397_v22 = vrot.slane %v3990_v14, 6 }
 0x671   : > { %v2448_v49 = vsel %vm2343_vm9, %v2447_v46, %v2446_v12  ;;  %v2379_v24 = vsel %vm2343_vm9, %v2378_v51, %v2377_v6  ;;  %v2414_v26 = vrot.slane %v3990_v14, 7  ;;  %v2413_v45 = vsel %vm2343_vm9, %v3993_v15, %v2412_v40 }
 0x672   : > { %v2450_v27 = vsel %vm2346_vm10, %v2449_v19, %v2448_v49  ;;  %v2381_v28 = vsel %vm2346_vm10, %v2380_v20, %v2379_v24  ;;  %v2362_v29 = vsel %vm2343_vm9, %v2361_v35, %v2360_v16  ;;  %v2396_v5 = vsel %vm2343_vm9, %v2395_v33, %v2394_v17 }
 0x673   : > { %v2364_v31 = vsel %vm2346_vm10, %v2363_v4, %v2362_v29  ;;  %v2398_v39 = vsel %vm2346_vm10, %v2397_v22, %v2396_v5  ;;  %v3271_v43 = vpop.permute.xlu1 %3270  ;;  %v2430_v48 = vrot.slane %v3993_v15, 1  ;;  %v2460_v44 = vrot.slane %v3972_v7, 5 }
 0x674   : > { %v3273_v53 = vunpack.i.h.bf16 %v3271_v43  ;;  %v3272_v1 = vunpack.i.l.bf16 %v3271_v43  ;;  %v2415_v55 = vsel %vm2346_vm10, %v2414_v26, %v2413_v45  ;;  %v2427_v56 = vsel %vm2337_vm7, %v2426_v41, %v3960_v37 }
 0x675   : > { %v2429_v57 = vsel %vm2340_vm8, %v2428_v47, %v2427_v56  ;;  %v2461_v58 = vsel %vm2337_vm7, %v2460_v44, %v3963_v38  ;;  %v2462_v8 = vrot.slane %v3969_v36, 4  ;;  %v2464_v42 = vrot.slane %v3993_v15, 3 }
 0x676   : > { %v2324_v59 = vsel %vm288_vm1, %v3341_v2, %v3273_v53  ;;  %v2323_v60 = vsel %vm288_vm1, %v3339_v52, %v3272_v1  ;;  %v2431_v34 = vsel %vm2343_vm9, %v2430_v48, %v2429_v57  ;;  %v2466_v38 = vrot.slane %v3990_v14, 2 }
 0x677   : > { %v2451_v61 = vsel %vm2349_vm11, %v2323_v60, %v2450_v27  ;;  %v2452_v62 = vrot.slane %v2324_v59, 7  ;;  %v2382_v37 = vrot.slane %v2323_v60, 4  ;;  %v2384_v63 = vrot.slane %v2324_v59, 3  ;;  %v2526_v43 = vpop.permute.xlu1 %2525 }
 0x678   : > { %v2365_v0 = vrot.slane %v2323_v60, 3  ;;  %v2367_v30 = vrot.slane %v2324_v59, 2  ;;  %v2399_v3 = vrot.slane %v2323_v60, 5  ;;  %v2401_v10 = vrot.slane %v2324_v59, 4 }
 0x679   : > { %v2453_v23 = vsel %vm2352_vm12, %v2452_v62, %v2451_v61  ;;  %v2383_v6 = vsel %vm2349_vm11, %v2382_v37, %v2381_v28  ;;  %v2416_v12 = vrot.slane %v2323_v60, 6  ;;  %v2418_v16 = vrot.slane %v2324_v59, 5 }
 0x67a   : > { %2454 = vrot.lane.b32.xlu0 %v2453_v23, %s3441_s11  ;;  %v2385_v13 = vsel %vm2352_vm12, %v2384_v63, %v2383_v6  ;;  %v2366_v50 = vsel %vm2349_vm11, %v2365_v0, %v2364_v31  ;;  %v2400_v54 = vsel %vm2349_vm11, %v2399_v3, %v2398_v39  ;;  %v2432_v51 = vsel %vm2346_vm10, %v3990_v14, %v2431_v34 }
 0x67b   : > { %2386 = vrot.lane.b32.xlu1 %v2385_v13, %s3438_s6  ;;  %v2368_v17 = vsel %vm2352_vm12, %v2367_v30, %v2366_v50  ;;  %v2402_v46 = vsel %vm2352_vm12, %v2401_v10, %v2400_v54  ;;  %v2417_v19 = vsel %vm2349_vm11, %v2416_v12, %v2415_v55  ;;  %v2433_v35 = vrot.slane %v2323_v60, 7  ;;  %v2543_v45 = vpop.permute.xlu1 %2542 }
 0x67c   : > { %v2419_v20 = vsel %vm2352_vm12, %v2418_v16, %v2417_v19  ;;  %v2435_v4 = vrot.slane %v2324_v59, 6  ;;  %v2463_v33 = vsel %vm2340_vm8, %v2462_v8, %v2461_v58  ;;  %v2468_v22 = vrot.slane %v2323_v60, 1 }
 0x67d   : > { %v2336_v49 = vrot.slane %v3972_v7, 6  ;;  %v2339_v24 = vrot.slane %v3969_v36, 5  ;;  %v2434_v25 = vsel %vm2349_vm11, %v2433_v35, %v2432_v51  ;;  %v2465_v26 = vsel %vm2343_vm9, %v2464_v42, %v2463_v33 }
 0x67e   : > { %2369 = vrot.lane.b32.xlu0 %v2368_v17, %s3437_s5  ;;  %v2342_v27 = vrot.slane %v3993_v15, 4  ;;  %v2345_v28 = vrot.slane %v3990_v14, 3  ;;  %v2436_v29 = vsel %vm2352_vm12, %v2435_v4, %v2434_v25  ;;  %v2467_v5 = vsel %vm2346_vm10, %v2466_v38, %v2465_v26  ;;  %s2670_s5 = sshll.u32 %s4091_s30, 4  ;;  %s4109_s5 = int_to_ptr.vmem [resolvable:$true] %s2670_s5 }
 0x67f   : > { %2593 = vrot.lane.b32.xlu1 %v3880_v11, %s3442_s12  ;;  %v2338_v36 = vsel %vm2337_vm7, %v2336_v49, %v3966_v32  ;;  %v2469_v7 = vsel %vm2349_vm11, %v2468_v22, %v2467_v5  ;;  %v2351_v39 = vrot.slane %v2324_v59, 1  ;;  %v2348_v40 = vrot.slane %v2323_v60, 2  ;;  %v2560_v48 = vpop.permute.xlu1 %2559 }
 0x680   : > { %v2341_v31 = vsel %vm2340_vm8, %v2339_v24, %v2338_v36  ;;  %v2470_v15 = vsel %vm2352_vm12, %v2324_v59, %v2469_v7  ;;  %vm2484_vm1 = vcmask 916480   ;;  %v2630_v59 = vsel %vm1747_vm5, %v3874_v9, %v2526_v43 }
 0x681   : > { %v2344_v14 = vsel %vm2343_vm9, %v2342_v27, %v2341_v31  ;;  %v2631_v42 = vsel %vm777_vm4, %v2630_v59, %v2543_v45 }
 0x682   : > { %2403 = vrot.lane.b32.xlu0 %v2402_v46, %s3439_s7  ;;  %v2347_v11 = vsel %vm2346_vm10, %v2345_v28, %v2344_v14  ;;  %v2632_v62 = vsel %vm2476_vm13, %v2631_v42, %v2560_v48 }
 0x683   : > { %2627 = vrot.lane.b32.xlu1 %v3890_v18, %s3443_s13  ;;  %v2350_v32 = vsel %vm2349_vm11, %v2348_v40, %v2347_v11  ;;  %v2577_v53 = vpop.permute.xlu1 %2576 }
 0x684   : > { %v2353_v41 = vsel %vm2352_vm12, %v2351_v39, %v2350_v32  ;;  %v2633_v9 = vsel %vm2478_vm14, %v2632_v62, %v2577_v53 }
 0x686   : > { %2420 = vrot.lane.b32.xlu0 %v2419_v20, %s3440_s8  ;;  %s4098_s8 = scalar_lea.hbm %s4176_s3, %s2865_s23 }
 0x68a   : > { %2437 = vrot.lane.b32.xlu0 %v2436_v29, %s3442_s12  ;;  %s3342_s12 = scalar_lea.vmem %s4100_s28, 64 }
 0x68b   : > { %p3343_p11 = scmp.ne.s32.totalorder %s4100_s28, %s3342_s12 }
 0x68d   : > { %p3344_p12 = pnand %p3343_p11, %p3509_p5 }
 0x68e   : > { %2471 = vrot.lane.b32.xlu0 %v2470_v15, %s3443_s13  ;;  %s3444_s13 = smov [#allocation3]  }
 0x68f   : > { %p3345_p13 = pneg %p3344_p12  ;;  %s3346_s20 = sshll.u32 %s3444_s13, 4  ;;  %s3347_s20 = int_to_ptr.vmem [resolvable:$false] %s3346_s20 }
 0x690   : > { %s3348_s22 = scalar_lea.vmem %s3347_s20, 128  ;;  %p3349_p0 = scmp.lt.s32.totalorder %s4100_s28, %s3347_s20 }
 0x691   : > { %p3350_p1 = scmp.lt.s32.totalorder %s3348_s22, %s3342_s12 }
 0x692   : > { %2610 = vrot.lane.b32.xlu0 %v3897_v21, %s3441_s11  ;;  %s2639_s11 = scalar_lea.sflag [#allocation4], %s4076_s14 }
 0x693   : > { %p3351_p2 = por %p3350_p1, %p3349_p0 }
 0x695   : > { %p3352_p3 = pnand %p3351_p2, %p3345_p13 }
 0x6ec   : > { %v2455_v47 = vpop.permute.xlu0 %2454 }
 0x6ed   : > { %v2387_v55 = vpop.permute.xlu1 %2386 }
 0x6f0   : > { %v2370_v44 = vpop.permute.xlu0 %2369 }
 0x6f1   : > { %v2474_v18 = vsel %vm1747_vm5, %v2353_v41, %v2370_v44  ;;  %v2594_v8 = vpop.permute.xlu1 %2593 }
 0x6f2   : > { %v2475_v56 = vsel %vm777_vm4, %v2474_v18, %v2387_v55  ;;  %v2634_v63 = vsel %vm2480_vm15, %v2633_v9, %v2594_v8 }
 0x6f4   : > { %v2404_v52 = vpop.permute.xlu0 %2403 }
 0x6f5   : > { %v2477_v21 = vsel %vm2476_vm13, %v2475_v56, %v2404_v52  ;;  %v2628_v30 = vpop.permute.xlu1 %2627 }
 0x6f8   : > { %v2421_v1 = vpop.permute.xlu0 %2420 }
 0x6f9   : > { %v2479_v2 = vsel %vm2478_vm14, %v2477_v21, %v2421_v1 }
 0x6fc   : > { %v2438_v57 = vpop.permute.xlu0 %2437 }
 0x6fd   : > { %v2481_v58 = vsel %vm2480_vm15, %v2479_v2, %v2438_v57 }
 0x6fe   : > { %v2483_v34 = vsel %vm2482_vm0, %v2481_v58, %v2455_v47 }
 0x700   : > { %v2472_v60 = vpop.permute.xlu0 %2471 }
 0x701   : > { %v2485_v61 = vsel %vm2484_vm1, %v2483_v34, %v2472_v60 }
 0x702   : > { %v2486_v37 = vpack.c.bf16 %v2485_v61, %v2485_v61 }
 0x704   : > { %v2611_v0 = vpop.permute.xlu0 %2610  ;;  %2487 = vst [vmem:[%s211_s27] sm:$0xf] %v2486_v37 }
 0x705   : > { %v2635_v3 = vsel %vm2482_vm0, %v2634_v63, %v2611_v0 }
 0x706   : > { %3355 = shalt.err (!%p3352_p3)
}
 0x707   : > { %s3356_s23 = scalar_lea.hbm %s4098_s8, 64  ;;  %s3360_s6 = scalar_lea.hbm %s4176_s3, 128 }
 0x708   : > { %p3357_p4 = scmp.ne.s32.totalorder %s4098_s8, %s3356_s23  ;;  %p3361_p9 = scmp.lt.s32.totalorder %s4098_s8, %s4176_s3 }
 0x709   : > { %p3362_p10 = scmp.lt.s32.totalorder %s3360_s6, %s3356_s23 }
 0x70a   : > { %p3358_p7 = pnand %p3357_p4, %p3509_p5 }
 0x70b   : > { %p3363_p11 = por %p3362_p10, %p3361_p9 }
 0x70c   : > { %p3359_p8 = pneg %p3358_p7 }
 0x70e   : > { %p3364_p12 = pnand %p3363_p11, %p3359_p8 }
 0x710   : > { %3367 = shalt.err (!%p3364_p12)
}
 0x711   : > { %3200 = dma.vmem_to_hbm [thread:$0]  (%p3509_p5), %s4100_s28, 64, %s4098_s8, %s2639_s11   ;;  %v2636_v38 = vsel %vm2484_vm1, %v2635_v3, %v2628_v30 }
 0x712   : > { %2637 = vst [vmem:[%s4091_s30] sm:$0xff] %v2636_v38  ;;  %s2644_s9 = scalar_lea.sflag [#allocation6], %s4076_s14  ;;  %s3368_s12 = scalar_lea.vmem %s4109_s5, 128 }
 0x713   : > { %p3369_p13 = scmp.ne.s32.totalorder %s4109_s5, %s3368_s12  ;;  %s3445_s13 = smov [#allocation5]  }
 0x714   : > { %s3372_s20 = sshll.u32 %s3445_s13, 4  ;;  %s3373_s20 = int_to_ptr.vmem [resolvable:$false] %s3372_s20 }
 0x715   : > { %p3370_p0 = pnand %p3369_p13, %p3509_p5  ;;  %s3374_s22 = scalar_lea.vmem %s3373_s20, 256 }
 0x716   : > { %p3375_p2 = scmp.lt.s32.totalorder %s4109_s5, %s3373_s20  ;;  %p3376_p3 = scmp.lt.s32.totalorder %s3374_s22, %s3368_s12 }
 0x717   : > { %p3371_p1 = pneg %p3370_p0 }
 0x718   : > { %p3377_p4 = por %p3376_p3, %p3375_p2 }
 0x71a   : > { %p3378_p7 = pnand %p3377_p4, %p3371_p1 }
 0x71c   : > { %3381 = shalt.err (!%p3378_p7)
}
 0x71d   : > { %s3382_s28 = scalar_lea.hbm %s4107_s10, 128  ;;  %s3386_s8 = scalar_lea.hbm %s4177_s4, 256 }
 0x71e   : > { %p3383_p8 = scmp.ne.s32.totalorder %s4107_s10, %s3382_s28  ;;  %p3387_p11 = scmp.lt.s32.totalorder %s4107_s10, %s4177_s4 }
 0x71f   : > { %p3388_p12 = scmp.lt.s32.totalorder %s3386_s8, %s3382_s28 }
 0x720   : > { %p3384_p9 = pnand %p3383_p8, %p3509_p5 }
 0x721   : > { %p3389_p13 = por %p3388_p12, %p3387_p11 }
 0x722   : > { %p3385_p10 = pneg %p3384_p9 }
 0x724   : > { %p3390_p0 = pnand %p3389_p13, %p3385_p10 }
 0x726   : > { %3393 = shalt.err (!%p3390_p0)
}
 0x727   : > { %3201 = dma.vmem_to_hbm [thread:$0]  (%p3509_p5), %s4109_s5, 128, %s4107_s10, %s2644_s9  }
 0x728 PF: > { %p3211_p1 = scmp.ge.s32.totalorder %s3432_s18, 2  ;;  %s2682_s27 = sand.u32 1, %s3420_s15  }
 0x729   : > { %s2683_s29 = scalar_lea.sflag [#allocation4], %s2682_s27 }
 0x72a   : > { %p3205_p2 = pnand %p3211_p1, %p3513_p6 }
 0x72c   : > { %p3206_p3 = pneg %p3205_p2 }
 0x72e   : > { %3411 = dma.done.wait (%p3206_p3), %s2683_s29, 64  }
 0x72f   : > { %3413 = vsyncadd (%p3206_p3), %s2683_s29, 4294967232  ;;  %s2692_s6 = scalar_lea.sflag [#allocation6], %s2682_s27 }
 0x730   : > { %3415 = dma.done.wait (%p3206_p3), %s2692_s6, 128  }
 0x731   : > { %3417 = vsyncadd (%p3206_p3), %s2692_s6, 4294967168  ;;  %p18_p5 = scmp.ge.s32.totalorder %s3496_s21, 4   ;;  %s4180_s15 = smov %s3424_s16 }
 0x732   : > { %s4181_s16 = smov %s3428_s17  ;;  %s4182_s17 = smov %s3507_s24 }
 0x733   : > { %s4183_s18 = smov %s3496_s21  ;;  %20 = sbr.rel (!%p18_p5) target bundleno = 5 (0x5), region = 87 }
 0x738   :  { %2697 = vsyncpa [#allocation4], 1 }
 0x739   :  { %2699 = vsyncpa [#allocation4 + $0x1], 1 }
 0x73a   :  { %2700 = vsyncpa [#allocation6], 1 }
 0x73b   :  { %2702 = vsyncpa [#allocation6 + $0x1], 1 }

</bundles_post_ra>
